<compile_context>
chip_gen: v7x
topology: tpu7x:2x2x1
jax: 0.10.0
libtpu: 0.0.40
codegen_flags: <defaults>
</compile_context>

<pallas_src>
import functools

import jax
import jax.numpy as jnp
from jax.experimental import pallas as pl
from jax.experimental.pallas import tpu as pltpu

LANE = 128
SUBLANE = 8


def _cdiv(a, b):
    return -(-a // b)


def _round_up(n, m):
    return _cdiv(n, m) * m


def _device_kind():
    try:
        return jax.devices()[0].device_kind.lower()
    except Exception:
        return ""


def _is_v6_or_newer(kind):
    return any(tag in kind for tag in ("v6", "v7", "tpu7", "tpu8"))


def _default_block_b(kind):
    # v6e/v7x: 32 MiB scoped-VMEM default comfortably holds the tb=1024 intermediates.
    # v5e (16 MiB scoped default) and older chips: cap at 512.
    return 1024 if _is_v6_or_newer(kind) else 512


def _default_bf16_epilogue(kind):
    # v6e/v7x have bf16 VPU ALUs; older chips keep the epilogue in f32.
    return _is_v6_or_newer(kind)


def _choose_batch_tiling(B, block_b):
    """Pick (tile_b, padded_B): >= 2 grid steps (v7x megacore) and minimal ragged
    padding (tb is the smallest multiple of 8 that covers B in n_tiles tiles)."""
    n_tiles = max(2, _cdiv(B, block_b))
    tb = _round_up(_cdiv(B, n_tiles), SUBLANE)
    return tb, n_tiles * tb


def qnetwork_kernel(x_ref, w1_ref, b1_ref, w2_ref, b2_ref, w3_ref, b3_ref, o_ref,
                    *, bf16_epilogue):
    ep = jnp.bfloat16 if bf16_epilogue else jnp.float32

    # fc1: bf16 MXU matmul, f32 accumulation; bias + ReLU in `ep`; feed fc2 in bf16.
    x = x_ref[...].astype(jnp.bfloat16)
    h1 = jnp.dot(x, w1_ref[...], preferred_element_type=jnp.float32)
    h1 = jnp.maximum(h1.astype(ep) + b1_ref[...].astype(ep), 0.0).astype(jnp.bfloat16)

    # fc2
    h2 = jnp.dot(h1, w2_ref[...], preferred_element_type=jnp.float32)
    h2 = jnp.maximum(h2.astype(ep) + b2_ref[...].astype(ep), 0.0).astype(jnp.bfloat16)

    # fc3 (lane-padded output columns, no activation); final bias add stays f32.
    out = jnp.dot(h2, w3_ref[...], preferred_element_type=jnp.float32)
    o_ref[...] = (out + b3_ref[...]).astype(o_ref.dtype)


def qnetwork_forward(x, params, *, block_b=None, bf16_epilogue=None):
    """x: [B, input_dim] float32. Returns [B, output_dim] float32.

    Note: at tiny B this call is bound by the ~1.2 MiB weight HBM->VMEM DMA; batch
    multiple states per call when that path matters."""
    kind = _device_kind()
    if block_b is None:
        block_b = _default_block_b(kind)
    if bf16_epilogue is None:
        bf16_epilogue = _default_bf16_epilogue(kind)

    w1, b1, w2, b2, w3, b3 = (params[k] for k in ("w1", "b1", "w2", "b2", "w3", "b3"))
    out_dim = params["out_dim"]
    out_pad = w3.shape[1]
    B, d_in = x.shape

    tb, b_pad = _choose_batch_tiling(B, block_b)
    if b_pad != B:
        x = jnp.pad(x, ((0, b_pad - B), (0, 0)))

    def resident(arr):
        # Constant block index across grid steps -> DMA'd once, stays VMEM-resident.
        assert arr.ndim == 2
        return pl.BlockSpec(arr.shape, lambda i: (0, 0))

    kernel = functools.partial(qnetwork_kernel, bf16_epilogue=bf16_epilogue)

    out_padded = pl.pallas_call(
        kernel,
        out_shape=jax.ShapeDtypeStruct((b_pad, out_pad), jnp.float32),
        grid=(b_pad // tb,),
        in_specs=[
            pl.BlockSpec((tb, d_in), lambda i: (i, 0)),
            resident(w1), resident(b1),
            resident(w2), resident(b2),
            resident(w3), resident(b3),
        ],
        out_specs=pl.BlockSpec((tb, out_pad), lambda i: (i, 0)),
        compiler_params=pltpu.CompilerParams(
            dimension_semantics=("parallel",),
        ),
    )(x, w1, b1, w2, b2, w3, b3)

    return out_padded[:B, :out_dim]


def init_params(key, input_dim, output_dim):
    """Mirrors nn.Linear init (U(+-1/sqrt(fan_in))). Weights pre-transposed to
    [d_in, d_out] and stored bf16; fc3 columns zero-padded to a lane multiple so the
    kernel's output store is lane-dense. Biases stay f32 (cast in-kernel when the
    bf16 epilogue is used)."""
    out_pad = _round_up(max(output_dim, 1), LANE)
    dims = [(input_dim, 1024, 1024), (1024, 512, 512), (512, output_dim, out_pad)]
    params = {"out_dim": output_dim}
    for i, (d_in, d_out, d_store) in enumerate(dims, start=1):
        key, kw, kb = jax.random.split(key, 3)
        bound = 1.0 / float(d_in) ** 0.5
        w = jax.random.uniform(kw, (d_in, d_out), jnp.float32, minval=-bound, maxval=bound)
        b = jax.random.uniform(kb, (1, d_out), jnp.float32, minval=-bound, maxval=bound)
        if d_store != d_out:
            w = jnp.pad(w, ((0, 0), (0, d_store - d_out)))
            b = jnp.pad(b, ((0, 0), (0, d_store - d_out)))
        params[f"w{i}"] = w.astype(jnp.bfloat16)
        params[f"b{i}"] = b
    return params


def reference_forward(x, params, *, bf16_epilogue):
    """Pure-JAX reference that mirrors the kernel's quantization/epilogue path."""
    ep = jnp.bfloat16 if bf16_epilogue else jnp.float32
    out_dim = params["out_dim"]
    h = jnp.dot(x.astype(jnp.bfloat16), params["w1"], preferred_element_type=jnp.float32)
    h = jnp.maximum(h.astype(ep) + params["b1"].astype(ep), 0.0).astype(jnp.bfloat16)
    h = jnp.dot(h, params["w2"], preferred_element_type=jnp.float32)
    h = jnp.maximum(h.astype(ep) + params["b2"].astype(ep), 0.0).astype(jnp.bfloat16)
    out = jnp.dot(h, params["w3"], preferred_element_type=jnp.float32) + params["b3"]
    return out[:, :out_dim]


if __name__ == "__main__":
    B, input_dim, output_dim = 2, 32, 8

    key = jax.random.PRNGKey(0)
    key, kx = jax.random.split(key)
    x = jax.random.normal(kx, (B, input_dim), jnp.float32)
    params = init_params(key, input_dim, output_dim)

    bf16_ep = _default_bf16_epilogue(_device_kind())

    out = jax.block_until_ready(qnetwork_forward(x, params, bf16_epilogue=bf16_ep))
    ref = reference_forward(x, params, bf16_epilogue=bf16_ep)

    assert out.shape == (B, output_dim)
    max_err = float(jnp.max(jnp.abs(out - ref)))
    assert jnp.allclose(out, ref, atol=1e-2, rtol=1e-2), max_err

    print("KERNEL_OK")
</pallas_src>

<mosaic_0001>
module attributes {stable_mosaic.version = 11 : i64} {
  func.func @qnetwork_kernel(%arg0: i32, %arg1: memref<8x32xf32, #tpu.memory_space<vmem>>, %arg2: memref<32x1024xbf16, #tpu.memory_space<vmem>>, %arg3: memref<1x1024xf32, #tpu.memory_space<vmem>>, %arg4: memref<1024x512xbf16, #tpu.memory_space<vmem>>, %arg5: memref<1x512xf32, #tpu.memory_space<vmem>>, %arg6: memref<512x128xbf16, #tpu.memory_space<vmem>>, %arg7: memref<1x128xf32, #tpu.memory_space<vmem>>, %arg8: memref<8x128xf32, #tpu.memory_space<vmem>>) attributes {dimension_semantics = [#tpu.dimension_semantics<parallel>], iteration_bounds = array<i64: 2>, scalar_prefetch = 0 : i64, scratch_operands = 0 : i64, tpu.core_type = #tpu.core_type<tc>, window_params = [{transform_indices = @transform_0, window_bounds = array<i64: 8, 32>}, {pipeline_mode = #tpu.pipeline_mode<synchronous>, transform_indices = @transform_1, window_bounds = array<i64: 32, 1024>}, {pipeline_mode = #tpu.pipeline_mode<synchronous>, transform_indices = @transform_2, window_bounds = array<i64: 1, 1024>}, {pipeline_mode = #tpu.pipeline_mode<synchronous>, transform_indices = @transform_3, window_bounds = array<i64: 1024, 512>}, {pipeline_mode = #tpu.pipeline_mode<synchronous>, transform_indices = @transform_4, window_bounds = array<i64: 1, 512>}, {pipeline_mode = #tpu.pipeline_mode<synchronous>, transform_indices = @transform_5, window_bounds = array<i64: 512, 128>}, {pipeline_mode = #tpu.pipeline_mode<synchronous>, transform_indices = @transform_6, window_bounds = array<i64: 1, 128>}, {transform_indices = @transform_7, window_bounds = array<i64: 8, 128>}]} {
    %c0 = arith.constant 0 : index
    %c0_0 = arith.constant 0 : index
    %0 = vector.load %arg1[%c0, %c0_0] : memref<8x32xf32, #tpu.memory_space<vmem>>, vector<8x32xf32>
    %1 = arith.truncf %0 : vector<8x32xf32> to vector<8x32xbf16>
    %c0_1 = arith.constant 0 : index
    %c0_2 = arith.constant 0 : index
    %2 = vector.load %arg2[%c0_1, %c0_2] : memref<32x1024xbf16, #tpu.memory_space<vmem>>, vector<32x1024xbf16>
    %cst = arith.constant dense<0.000000e+00> : vector<8x1024xf32>
    %3 = tpu.matmul %1, %2, %cst {dimension_numbers = #tpu.dot_dimension_numbers<[1], [0], [0], [1], [0, 0, 1, 1], [], []>} : vector<8x32xbf16>, vector<32x1024xbf16>, vector<8x1024xf32> -> vector<8x1024xf32>
    %c0_3 = arith.constant 0 : index
    %c0_4 = arith.constant 0 : index
    %4 = vector.load %arg3[%c0_3, %c0_4] : memref<1x1024xf32, #tpu.memory_space<vmem>>, vector<1x1024xf32>
    %5 = vector.broadcast %4 : vector<1x1024xf32> to vector<8x1024xf32>
    %6 = arith.addf %3, %5 : vector<8x1024xf32>
    %cst_5 = arith.constant 0.000000e+00 : f32
    %7 = vector.broadcast %cst_5 : f32 to vector<8x1024xf32>
    %8 = arith.maximumf %6, %7 : vector<8x1024xf32>
    %9 = arith.truncf %8 : vector<8x1024xf32> to vector<8x1024xbf16>
    %c0_6 = arith.constant 0 : index
    %c0_7 = arith.constant 0 : index
    %10 = vector.load %arg4[%c0_6, %c0_7] : memref<1024x512xbf16, #tpu.memory_space<vmem>>, vector<1024x512xbf16>
    %cst_8 = arith.constant dense<0.000000e+00> : vector<8x512xf32>
    %11 = tpu.matmul %9, %10, %cst_8 {dimension_numbers = #tpu.dot_dimension_numbers<[1], [0], [0], [1], [0, 0, 1, 1], [], []>} : vector<8x1024xbf16>, vector<1024x512xbf16>, vector<8x512xf32> -> vector<8x512xf32>
    %c0_9 = arith.constant 0 : index
    %c0_10 = arith.constant 0 : index
    %12 = vector.load %arg5[%c0_9, %c0_10] : memref<1x512xf32, #tpu.memory_space<vmem>>, vector<1x512xf32>
    %13 = vector.broadcast %12 : vector<1x512xf32> to vector<8x512xf32>
    %14 = arith.addf %11, %13 : vector<8x512xf32>
    %cst_11 = arith.constant 0.000000e+00 : f32
    %15 = vector.broadcast %cst_11 : f32 to vector<8x512xf32>
    %16 = arith.maximumf %14, %15 : vector<8x512xf32>
    %17 = arith.truncf %16 : vector<8x512xf32> to vector<8x512xbf16>
    %c0_12 = arith.constant 0 : index
    %c0_13 = arith.constant 0 : index
    %18 = vector.load %arg6[%c0_12, %c0_13] : memref<512x128xbf16, #tpu.memory_space<vmem>>, vector<512x128xbf16>
    %cst_14 = arith.constant dense<0.000000e+00> : vector<8x128xf32>
    %19 = tpu.matmul %17, %18, %cst_14 {dimension_numbers = #tpu.dot_dimension_numbers<[1], [0], [0], [1], [0, 0, 1, 1], [], []>} : vector<8x512xbf16>, vector<512x128xbf16>, vector<8x128xf32> -> vector<8x128xf32>
    %c0_15 = arith.constant 0 : index
    %c0_16 = arith.constant 0 : index
    %20 = vector.load %arg7[%c0_15, %c0_16] : memref<1x128xf32, #tpu.memory_space<vmem>>, vector<1x128xf32>
    %21 = vector.broadcast %20 : vector<1x128xf32> to vector<8x128xf32>
    %22 = arith.addf %19, %21 : vector<8x128xf32>
    %c0_17 = arith.constant 0 : index
    %c0_18 = arith.constant 0 : index
    %23 = vector.load %arg8[%c0_17, %c0_18] : memref<8x128xf32, #tpu.memory_space<vmem>>, vector<8x128xf32>
    tpu.vector_store %arg8[%c0_17, %c0_18], %22 {strides = array<i32>} : memref<8x128xf32, #tpu.memory_space<vmem>>, vector<8x128xf32>,
    return
  }
  func.func @transform_0(%arg0: i32) -> (i32, i32) {
    %c0_i32 = arith.constant 0 : i32
    %c0_i32_0 = arith.constant 0 : i32
    return %arg0, %c0_i32 : i32, i32
  }
  func.func @transform_1(%arg0: i32) -> (i32, i32) {
    %c0_i32 = arith.constant 0 : i32
    %c0_i32_0 = arith.constant 0 : i32
    %c0_i32_1 = arith.constant 0 : i32
    return %c0_i32, %c0_i32_0 : i32, i32
  }
  func.func @transform_2(%arg0: i32) -> (i32, i32) {
    %c0_i32 = arith.constant 0 : i32
    %c0_i32_0 = arith.constant 0 : i32
    %c0_i32_1 = arith.constant 0 : i32
    return %c0_i32, %c0_i32_0 : i32, i32
  }
  func.func @transform_3(%arg0: i32) -> (i32, i32) {
    %c0_i32 = arith.constant 0 : i32
    %c0_i32_0 = arith.constant 0 : i32
    %c0_i32_1 = arith.constant 0 : i32
    return %c0_i32, %c0_i32_0 : i32, i32
  }
  func.func @transform_4(%arg0: i32) -> (i32, i32) {
    %c0_i32 = arith.constant 0 : i32
    %c0_i32_0 = arith.constant 0 : i32
    %c0_i32_1 = arith.constant 0 : i32
    return %c0_i32, %c0_i32_0 : i32, i32
  }
  func.func @transform_5(%arg0: i32) -> (i32, i32) {
    %c0_i32 = arith.constant 0 : i32
    %c0_i32_0 = arith.constant 0 : i32
    %c0_i32_1 = arith.constant 0 : i32
    return %c0_i32, %c0_i32_0 : i32, i32
  }
  func.func @transform_6(%arg0: i32) -> (i32, i32) {
    %c0_i32 = arith.constant 0 : i32
    %c0_i32_0 = arith.constant 0 : i32
    %c0_i32_1 = arith.constant 0 : i32
    return %c0_i32, %c0_i32_0 : i32, i32
  }
  func.func @transform_7(%arg0: i32) -> (i32, i32) {
    %c0_i32 = arith.constant 0 : i32
    %c0_i32_0 = arith.constant 0 : i32
    return %arg0, %c0_i32 : i32, i32
  }
}

</mosaic_0001>

<bundles_post_ra>
// kernel: tpu_custom_call.1
= control target key start
LH: loop header
LB: loop body
LE: loop exit
PB: predicated region body
PF: predicated region fallthrough
CT: control target
= control target key end

     0   :  { %12 = vsyncpa [#allocation3], 0  ;;  %s4558_s0 = inlined_call_operand.hbm [shape: f32[16,32], index: 0, kind: input, shape index: {}]   ;;  %s4559_s1 = inlined_call_operand.hbm [shape: bf16[32,1024], index: 1, kind: input, shape index: {}]   ;;  %s4560_s2 = inlined_call_operand.hbm [shape: f32[1,1024], index: 2, kind: input, shape index: {}]   ;;  %s4561_s3 = inlined_call_operand.hbm [shape: bf16[1024,512], index: 3, kind: input, shape index: {}]   ;;  %s4562_s4 = inlined_call_operand.vmem [shape: f32[1,512], index: 4, kind: input, shape index: {}]   ;;  %s4563_s5 = inlined_call_operand.hbm [shape: bf16[512,128], index: 5, kind: input, shape index: {}]   ;;  %s4564_s6 = inlined_call_operand.vmem [shape: f32[1,128], index: 6, kind: input, shape index: {}]   ;;  %s4565_s7 = inlined_call_operand.hbm [shape: f32[16,128], index: 7, kind: output, shape index: {}]  }
   0x1   :  { %14 = vsyncpa [#allocation3 + $0x1], 0 }
   0x2   :  { %15 = vsyncpa [#allocation6], 0 }
   0x3   :  { %16 = vsyncpa [#allocation9], 0 }
   0x4   :  { %17 = vsyncpa [#allocation4], 0 }
   0x5   :  { %19 = vsyncpa [#allocation4 + $0x1], 0  ;;  %s4217_s24 = smov 0   ;;  %s4219_s25 = smov 0  }
   0x6   :  { %s4221_s26 = smov 0   ;;  %s4223_s27 = smov 0  }
   0x7 LB: > { %s4164_s28 = smov [#allocation5]   ;;  %s4238_s30 = sadd.s32 4294967295, %s4162_s27   ;;  %s4162_s27 = sphi %s4223_s27, %s4589_s27   ;;  %s4158_s26 = sphi %s4221_s26, %s4588_s26   ;;  %s4154_s25 = sphi %s4219_s25, %s4587_s25   ;;  %s4150_s24 = sphi %s4217_s24, %s4586_s24  }
   0x8   : > { %s220_s29 = sshll.u32 %s4164_s28, 4  ;;  %p3036_p0 = scmp.ge.s32.totalorder %s4162_s27, 1  ;;  %s4243_s29 = int_to_ptr.vmem [resolvable:$true] %s220_s29 }
   0x9   : > { %p4566_p1 = scmp.eq.s32.totalorder %s4238_s30, 0  ;;  %p208_p2 = scmp.lt.s32.totalorder %s4162_s27, 3 }
   0xa   : > { %s4165_s9 = smov [#allocation8]   ;;  %s4166_s12 = smov [#allocation7]  }
   0xb   : > { %p4245_p3 = pnand %p3036_p0, %p208_p2  ;;  %s244_s10 = sshll.u32 %s4165_s9, 4  ;;  %s4258_s10 = int_to_ptr.vmem [resolvable:$true] %s244_s10 }
   0xc   : > { %s4260_s13 = sshll.u32 %s4166_s12, 4  ;;  %s3946_s16 = scalar_lea.hbm %s4559_s1, 2048  ;;  %s235_s13 = int_to_ptr.vmem [resolvable:$true] %s4260_s13 }
   0xd   : > { %s4569_s8 = scalar_select %p4245_p3, 1, 0 }
   0xe   : > { %p3456_p5 = pneg %p4245_p3  ;;  %p3947_p7 = scmp.ne.s32.totalorder %s4559_s1, %s3946_s16 }
   0xf   : > { %p3953_p11 = scmp.lt.u32.totalorder %s3946_s16, %s4559_s1 }
  0x10   : > { %p4254_p6 = pnand %p3456_p5, %p4566_p1 }
  0x12   : > { %p4270_p8 = pneg %p4254_p6 }
  0x14   : > { %p3949_p9 = pnand %p4270_p8, %p3947_p7 }
  0x16   : > { %p3950_p10 = pneg %p3949_p9 }
  0x18   : > { %p3955_p12 = pnand %p3953_p11, %p3950_p10 }
  0x1a   : > { %3958 = shalt.err (!%p3955_p12)
}
  0x1b   : > { %s3959_s22 = scalar_lea.vmem %s4243_s29, 2048  ;;  %p3967_p5 = scmp.lt.s32.totalorder %s4243_s29, %s4243_s29 }
  0x1c   : > { %p3960_p13 = scmp.ne.s32.totalorder %s4243_s29, %s3959_s22  ;;  %p3968_p4 = scmp.lt.s32.totalorder %s3959_s22, %s3959_s22 }
  0x1e   : > { %p3962_p0 = pnand %p3960_p13, %p4270_p8  ;;  %p3969_p7 = por %p3968_p4, %p3967_p5 }
  0x20   : > { %p3963_p2 = pneg %p3962_p0 }
  0x22   : > { %p3970_p9 = pnand %p3969_p7, %p3963_p2 }
  0x24   : > { %3973 = shalt.err (!%p3970_p9)
}
  0x25   : > { %s4167_s23 = smov 512   ;;  %s4168_s28 = smov 32  }
  0x26   : > { %3459 = dma.hbm_to_vmem [thread:$0]  (!%p4254_p6), %s4559_s1, 2048, %s4243_s29, [#allocation6], %s4167_s23, %s4167_s23, %s4168_s28  }
  0x27   : > { %s3974_s16 = scalar_lea.hbm %s4561_s3, 32768 }
  0x28   : > { %p3975_p4 = scmp.ne.s32.totalorder %s4561_s3, %s3974_s16  ;;  %p3981_p12 = scmp.lt.u32.totalorder %s3974_s16, %s4561_s3 }
  0x2a   : > { %p3977_p10 = pnand %p3975_p4, %p4270_p8 }
  0x2c   : > { %p3978_p11 = pneg %p3977_p10 }
  0x2e   : > { %p3983_p13 = pnand %p3981_p12, %p3978_p11 }
  0x30   : > { %3986 = shalt.err (!%p3983_p13)
}
  0x31   : > { %s3987_s29 = scalar_lea.vmem %s4258_s10, 32768  ;;  %p3995_p7 = scmp.lt.s32.totalorder %s4258_s10, %s4258_s10 }
  0x32   : > { %p3988_p0 = scmp.ne.s32.totalorder %s4258_s10, %s3987_s29  ;;  %p3996_p9 = scmp.lt.s32.totalorder %s3987_s29, %s3987_s29 }
  0x34   : > { %p3990_p2 = pnand %p3988_p0, %p4270_p8  ;;  %p3997_p4 = por %p3996_p9, %p3995_p7 }
  0x36   : > { %p3991_p5 = pneg %p3990_p2 }
  0x38   : > { %p3998_p10 = pnand %p3997_p4, %p3991_p5 }
  0x3a   : > { %4001 = shalt.err (!%p3998_p10)
}
  0x3b   : > { %s4169_s22 = smov 256   ;;  %s4170_s23 = smov 16  }
  0x3c   : > { %3465 = dma.hbm_to_vmem [thread:$0]  (!%p4254_p6), %s4561_s3, 32768, %s4258_s10, [#allocation9], %s4169_s22, %s4169_s22, %s4170_s23  }
  0x3d   : > { %s4002_s15 = scalar_lea.hbm %s4560_s2, 128 }
  0x3e   : > { %p4003_p11 = scmp.ne.s32.totalorder %s4560_s2, %s4002_s15  ;;  %p4009_p0 = scmp.lt.u32.totalorder %s4002_s15, %s4560_s2 }
  0x40   : > { %p4005_p12 = pnand %p4003_p11, %p4270_p8 }
  0x42   : > { %p4006_p13 = pneg %p4005_p12 }
  0x44   : > { %p4011_p2 = pnand %p4009_p0, %p4006_p13 }
  0x46   : > { %4014 = shalt.err (!%p4011_p2)
}
  0x47   : > { %s4015_s21 = scalar_lea.vmem %s235_s13, 128  ;;  %p4023_p4 = scmp.lt.s32.totalorder %s235_s13, %s235_s13 }
  0x48   : > { %p4016_p5 = scmp.ne.s32.totalorder %s235_s13, %s4015_s21  ;;  %p4024_p10 = scmp.lt.s32.totalorder %s4015_s21, %s4015_s21 }
  0x4a   : > { %p4018_p7 = pnand %p4016_p5, %p4270_p8  ;;  %p4025_p1 = por %p4024_p10, %p4023_p4 }
  0x4c   : > { %p4019_p9 = pneg %p4018_p7 }
  0x4e   : > { %p4026_p3 = pnand %p4025_p1, %p4019_p9 }
  0x50   : > { %4029 = shalt.err (!%p4026_p3)
}
  0x51   : > { %3462 = dma.hbm_to_vmem [thread:$0]  (!%p4254_p6), %s4560_s2, 128, %s235_s13, [#allocation6]  }
  0x52   : > { %s4171_s22 = smov [#allocation10]   ;;  %s4030_s12 = scalar_lea.hbm %s4563_s5, 4096 }
  0x53   : > { %s260_s23 = sshll.u32 %s4171_s22, 4  ;;  %p4031_p11 = scmp.ne.s32.totalorder %s4563_s5, %s4030_s12  ;;  %s261_s23 = int_to_ptr.vmem [resolvable:$true] %s260_s23 }
  0x54   : > { %p4037_p12 = scmp.lt.u32.totalorder %s4030_s12, %s4563_s5 }
  0x55   : > { %p4033_p1 = pnand %p4031_p11, %p4270_p8 }
  0x57   : > { %p4034_p3 = pneg %p4033_p1 }
  0x59   : > { %p4039_p13 = pnand %p4037_p12, %p4034_p3 }
  0x5b   : > { %4042 = shalt.err (!%p4039_p13)
}
  0x5c   : > { %s4043_s13 = scalar_lea.vmem %s261_s23, 4096  ;;  %p4051_p7 = scmp.lt.s32.totalorder %s261_s23, %s261_s23 }
  0x5d   : > { %p4044_p0 = scmp.ne.s32.totalorder %s261_s23, %s4043_s13  ;;  %p4052_p9 = scmp.lt.s32.totalorder %s4043_s13, %s4043_s13 }
  0x5f   : > { %p4046_p2 = pnand %p4044_p0, %p4270_p8  ;;  %p4053_p4 = por %p4052_p9, %p4051_p7 }
  0x61   : > { %p4047_p5 = pneg %p4046_p2 }
  0x63   : > { %p4054_p10 = pnand %p4053_p4, %p4047_p5 }
  0x65   : > { %4057 = shalt.err (!%p4054_p10)
}
  0x66   : > { %s4172_s18 = smov 64   ;;  %s4173_s19 = smov 4  }
  0x67   : > { %3468 = dma.hbm_to_vmem [thread:$0]  (!%p4254_p6), %s4563_s5, 4096, %s261_s23, [#allocation9], %s4172_s18, %s4172_s18, %s4173_s19  }
  0x68   : > { %s3035_s10 = sadd.s32 4294967294, %s4162_s27   ;;  %s4353_s29 = sadd.s32 1, %s4162_s27  }
  0x69   : > { %s29_s22 = ssub.s32 %s4162_s27, %s4353_s29  ;;  %s32_s28 = sadd.s32 1, %s4158_s26 }
  0x6a   : > { %p30_p8 = scmp.eq.s32.totalorder %s29_s22, 0  ;;  %p39_p11 = scmp.ne.s32.totalorder %s4158_s26, %s4154_s25 }
  0x6b   : > { %p40_p1 = scmp.eq.s32.totalorder %s4162_s27, 0  ;;  %p45_p3 = scmp.ne.s32.totalorder %s4154_s25, %s4150_s24 }
  0x6c   : > { %s4364_s9 = scalar_select %p30_p8, %s4158_s26, %s32_s28  }
  0x6d   : > { %p4366_p12 = por %p40_p1, %p39_p11  ;;  %p4573_p13 = scmp.eq.s32.totalorder %s4238_s30, 0 }
  0x6e   : > { %p195_p0 = scmp.eq.s32.totalorder %s4238_s30, 1  ;;  %p201_p2 = scmp.eq.s32.totalorder %s3035_s10, 1 }
  0x6f   : > { %p4372_p6 = por %p4573_p13, %p45_p3  ;;  %p3481_p5 = scmp.lt.s32.totalorder %s4162_s27, 2 }
  0x70   : > { %s277_s12 = sand.u32 1, %s4158_s26   ;;  %p4379_p7 = por %p195_p0, %p39_p11 }
  0x71   : > { %p4383_p9 = por %p201_p2, %p45_p3  ;;  %s3042_s16 = sshll.u32 %s277_s12, 3 }
  0x72   : > { %s4575_s14 = scalar_select %p4379_p7, 1, 0 }
  0x73   : > { %s4576_s15 = scalar_select %p4383_p9, 1, 0 }
  0x74   : > { %s3043_s17 = sshll.u32 %s4162_s27, 7  ;;  %s281_s20 = scalar_lea.vmem [#allocation2], %s3042_s16 }
  0x75   : > { %s4391_s19 = scalar_lea.hbm %s4558_s0, %s3043_s17  ;;  %s288_s21 = sshll.u32 %s281_s20, 4  ;;  %s4393_s21 = int_to_ptr.vmem [resolvable:$true] %s288_s21 }
  0x76   : > { %p4397_p4 = pnand %p3481_p5, %p4366_p12  ;;  %s278_s22 = scalar_lea.sflag [#allocation3], %s277_s12 }
  0x77   : > { %s4058_s28 = scalar_lea.hbm %s4391_s19, 128  ;;  %s4063_s13 = scalar_lea.hbm %s4558_s0, 256 }
  0x78   : > { %p4059_p10 = scmp.ne.s32.totalorder %s4391_s19, %s4058_s28  ;;  %p4060_p8 = pneg %p4397_p4 }
  0x79   : > { %p4064_p3 = scmp.lt.u32.totalorder %s4391_s19, %s4558_s0  ;;  %p4065_p12 = scmp.lt.u32.totalorder %s4063_s13, %s4058_s28 }
  0x7a   : > { %p4061_p11 = pnand %p4060_p8, %p4059_p10  ;;  %p4067_p0 = scmp.lt.u32.totalorder %s4058_s28, %s4391_s19 }
  0x7b   : > { %p4066_p13 = por %p4065_p12, %p4064_p3 }
  0x7c   : > { %p4062_p1 = pneg %p4061_p11 }
  0x7d   : > { %p4068_p2 = por %p4067_p0, %p4066_p13 }
  0x7f   : > { %p4069_p5 = pnand %p4068_p2, %p4062_p1 }
  0x81   : > { %4072 = shalt.err (!%p4069_p5)
}
  0x82   : > { %s4073_s12 = scalar_lea.vmem %s4393_s21, 128  ;;  %s4174_s20 = smov [#allocation2]  }
  0x83   : > { %p4074_p10 = scmp.ne.s32.totalorder %s4393_s21, %s4073_s12  ;;  %s4078_s16 = sshll.u32 %s4174_s20, 4  ;;  %s4079_s16 = int_to_ptr.vmem [resolvable:$false] %s4078_s16 }
  0x84   : > { %s4080_s17 = scalar_lea.vmem %s4079_s16, 256  ;;  %p4081_p7 = scmp.lt.s32.totalorder %s4393_s21, %s4079_s16 }
  0x85   : > { %p4076_p11 = pnand %p4074_p10, %p4060_p8  ;;  %p4082_p3 = scmp.lt.s32.totalorder %s4080_s17, %s4073_s12 }
  0x87   : > { %p4077_p9 = pneg %p4076_p11  ;;  %p4083_p12 = por %p4082_p3, %p4081_p7 }
  0x89   : > { %p4084_p13 = pnand %p4083_p12, %p4077_p9 }
  0x8b   : > { %4087 = shalt.err (!%p4084_p13)
}
  0x8c   : > { %3472 = dma.hbm_to_vmem [thread:$0]  (!%p4397_p4), %s4391_s19, 128, %s4393_s21, %s278_s22  }
  0x8d   : > { %p4578_p1 = scmp.ne.s32.totalorder %s4569_s8, 0 }
  0x8e   : > { %s4429_s28 = sand.u32 (!%p4578_p1), 1, %s4154_s25  }
  0x8f   : > { %297 = sbr.rel (%p4578_p1) target bundleno = 1034 (0x40a), region = 48  ;;  %s3045_s13 = sshll.u32 (!%p4578_p1), %s4429_s28, 3 }
  0x90   : > { %s300_s11 = scalar_lea.sflag (!%p4578_p1), [#allocation3], %s4429_s28  ;;  %s303_s18 = scalar_lea.vmem (!%p4578_p1), [#allocation2], %s3045_s13 }
  0x96   : > { %4133 = dma.done.wait (%p4372_p6), %s300_s11, 128  }
  0x97   : > { %4135 = vsyncadd (%p4372_p6), %s300_s11, 4294967168  ;;  %p4579_p7 = scmp.eq.s32.totalorder %s4238_s30, 0 }
  0x99   : > { %4137 = dma.done.wait (%p4579_p7), [#allocation6], 2176   ;;  %p4580_p9 = pmov %p4579_p7 }
  0x9a   : > { %p4581_p4 = pmov %p4579_p7 }
  0x9b   : > { %4139 = vsyncadd (%p4580_p9), [#allocation6], 4294965120 }
  0x9c   : > { %4141 = dma.done.wait (%p4581_p4), [#allocation9], 36864   ;;  %p4582_p8 = pmov %p4581_p4 }
  0x9d   : > { %v4175_v0 = vmov 0   ;;  %v353_v1 = vld [vmem:[#allocation5] sm:$0xff]  ;;  %v354_v7 = vld [vmem:[#allocation5 + $0x8] sm:$0xff]  ;;  %v355_v15 = vld [vmem:[#allocation5 + $0x10] sm:$0xff]  ;;  %vm491_vm0 = vcmask 261120   ;;  %s3361_s10 = sshll.u32 %s4238_s30, 7 }
  0x9e   : > { %4143 = vsyncadd (%p4582_p8), [#allocation9], 4294930432  ;;  %527 = vmatprep.mubr.bf16.mxu0 %v4175_v0  ;;  %568 = vmatprep.mubr.bf16.mxu1 %v4175_v0  ;;  %v357_v2 = vld [vmem:[#allocation5 + $0x20] sm:$0xff]  ;;  %v358_v9 = vld [vmem:[#allocation5 + $0x28] sm:$0xff]  ;;  %s349_s22 = scalar_lea.vmem [#allocation11], %s3045_s13  ;;  %s4514_s17 = scalar_lea.hbm %s4565_s7, %s3361_s10 }
  0x9f   : > { %v361_v3 = vld [vmem:[#allocation5 + $0x40] sm:$0xff]  ;;  %v3052_v4 = vcombine.high %v353_v1, %v357_v2  ;;  %v3051_v5 = vcombine.low %v353_v1, %v357_v2  ;;  %v362_v10 = vld [vmem:[#allocation5 + $0x48] sm:$0xff]  ;;  %v3054_v12 = vcombine.high %v354_v7, %v358_v9  ;;  %v3053_v13 = vcombine.low %v354_v7, %v358_v9  ;;  %v359_v16 = vld [vmem:[#allocation5 + $0x30] sm:$0xff]  ;;  %s2927_s12 = sshll.u32 %s349_s22, 4  ;;  %s2914_s11 = scalar_lea.sflag [#allocation4], %s4429_s28  ;;  %s4516_s12 = int_to_ptr.vmem [resolvable:$true] %s2927_s12 }
  0xa0   : > { %v365_v6 = vld [vmem:[#allocation5 + $0x60] sm:$0xff]  ;;  %v366_v11 = vld [vmem:[#allocation5 + $0x68] sm:$0xff]  ;;  %v351_v18 = vld [vmem:[%s303_s18] sm:$0xff]  ;;  %v3056_v21 = vcombine.high %v355_v15, %v359_v16  ;;  %v3055_v28 = vcombine.low %v355_v15, %v359_v16  ;;  %s4088_s18 = scalar_lea.vmem %s4516_s12, 128  ;;  %p4583_p0 = scmp.ne.s32.totalorder %s4575_s14, 0 }
  0xa1   : > { %v3060_v8 = vcombine.high %v361_v3, %v365_v6  ;;  %495 = vmatprep.subr.bf16.mxu0 %v3052_v4  ;;  %v3062_v14 = vcombine.high %v362_v10, %v366_v11  ;;  %v3059_v17 = vcombine.low %v361_v3, %v365_v6  ;;  %v356_v19 = vld [vmem:[#allocation5 + $0x18] sm:$0xff]  ;;  %536 = vmatprep.subr.bf16.mxu1 %v3054_v12  ;;  %v363_v23 = vld [vmem:[#allocation5 + $0x50] sm:$0xff]  ;;  %p4089_p6 = scmp.ne.s32.totalorder %s4516_s12, %s4088_s18  ;;  %s4176_s30 = smov [#allocation11]  }
  0xa2   : > { %496 = vmatpush1.bf16.msra.mxu0 %v3051_v5  ;;  %v360_v20 = vld [vmem:[#allocation5 + $0x38] sm:$0xff]  ;;  %537 = vmatpush1.bf16.msra.mxu1 %v3053_v13  ;;  %v3061_v22 = vcombine.low %v362_v10, %v366_v11  ;;  %v367_v24 = vld [vmem:[#allocation5 + $0x70] sm:$0xff]  ;;  %v352_v25 = vpack.c.bf16 %v351_v18, %v351_v18  ;;  %s4092_s13 = sshll.u32 %s4176_s30, 4  ;;  %s4093_s13 = int_to_ptr.vmem [resolvable:$false] %s4092_s13 }
  0xa3   : > { %497 = vmatprep.subr.bf16.mxu0 %v3060_v8  ;;  %538 = vmatprep.subr.bf16.mxu1 %v3062_v14  ;;  %v3058_v26 = vcombine.high %v356_v19, %v360_v20  ;;  %v364_v27 = vld [vmem:[#allocation5 + $0x58] sm:$0xff]  ;;  %v3064_v30 = vcombine.high %v363_v23, %v367_v24  ;;  %v3057_v31 = vcombine.low %v356_v19, %v360_v20  ;;  %v3535_v36 = vld [vmem:[#allocation8 + $0xc] ss:$16 sps:$4 sm:$0xff]   ;;  %v3533_v39 = vld [vmem:[#allocation8 + $0x8] ss:$16 sps:$4 sm:$0xff]   ;;  %p4090_p2 = pnand %p4089_p6, %p4583_p0  ;;  %s4094_s8 = scalar_lea.vmem %s4093_s13, 256 }
  0xa4   : > { %v368_v29 = vld [vmem:[#allocation5 + $0x78] sm:$0xff]  ;;  %v3063_v33 = vcombine.low %v363_v23, %v367_v24  ;;  %v3541_v40 = vld [vmem:[#allocation8 + $0x2c] ss:$16 sps:$4 sm:$0xff]   ;;  %v3539_v43 = vld [vmem:[#allocation8 + $0x28] ss:$16 sps:$4 sm:$0xff]   ;;  %p4095_p10 = scmp.lt.s32.totalorder %s4516_s12, %s4093_s13  ;;  %p4096_p11 = scmp.lt.s32.totalorder %s4094_s8, %s4088_s18 }
  0xa5   : > { %v3066_v32 = vcombine.high %v364_v27, %v368_v29  ;;  %v3532_v34 = vld [vmem:[#allocation8 + $0x4] ss:$16 sps:$4 sm:$0xff]   ;;  %v3065_v35 = vcombine.low %v364_v27, %v368_v29  ;;  %v3530_v37 = vld [vmem:[#allocation8] ss:$16 sps:$4 sm:$0xff]   ;;  %v3547_v44 = vld [vmem:[#allocation8 + $0x4c] ss:$16 sps:$4 sm:$0xff]   ;;  %p4091_p5 = pneg %p4090_p2 }
  0xa6   : > { %498 = vmatpush1.bf16.msra.mxu0 %v3059_v17  ;;  %539 = vmatpush1.bf16.msra.mxu1 %v3061_v22  ;;  %v3538_v38 = vld [vmem:[#allocation8 + $0x24] ss:$16 sps:$4 sm:$0xff]   ;;  %v3536_v41 = vld [vmem:[#allocation8 + $0x20] ss:$16 sps:$4 sm:$0xff]   ;;  %v3545_v47 = vld [vmem:[#allocation8 + $0x48] ss:$16 sps:$4 sm:$0xff]   ;;  %p4097_p3 = por %p4096_p11, %p4095_p10 }
  0xa7   : > { %577 = vmatprep.subr.bf16.mxu0 %v3056_v21  ;;  %618 = vmatprep.subr.bf16.mxu1 %v3058_v26  ;;  %v3544_v42 = vld [vmem:[#allocation8 + $0x44] ss:$16 sps:$4 sm:$0xff]   ;;  %v3542_v45 = vld [vmem:[#allocation8 + $0x40] ss:$16 sps:$4 sm:$0xff]   ;;  %v3553_v48 = vld [vmem:[#allocation8 + $0x6c] ss:$16 sps:$4 sm:$0xff]  }
  0xa8   : > { %v3550_v46 = vld [vmem:[#allocation8 + $0x64] ss:$16 sps:$4 sm:$0xff]   ;;  %v3548_v49 = vld [vmem:[#allocation8 + $0x60] ss:$16 sps:$4 sm:$0xff]   ;;  %v3551_v51 = vld [vmem:[#allocation8 + $0x68] ss:$16 sps:$4 sm:$0xff]   ;;  %p4098_p12 = pnand %p4097_p3, %p4091_p5 }
  0xa9   : > { %3067 = vmatmul.mubr.msk.bf16.vlgmr.msra.gmra.mrb[0].mxu0 %vm491_vm0, %v352_v25  ;;  %3068 = vmatmul.mubr.msk.bf16.vlgmr.msra.gmra.mrb[0].mxu1 %vm491_vm0, %v352_v25  ;;  %v3556_v50 = vld [vmem:[#allocation8 + $0x84] ss:$16 sps:$4 sm:$0xff]   ;;  %v3559_v52 = vld [vmem:[#allocation8 + $0x8c] ss:$16 sps:$4 sm:$0xff]   ;;  %v3554_v53 = vld [vmem:[#allocation8 + $0x80] ss:$16 sps:$4 sm:$0xff]  }
  0xaa   : > { %578 = vmatpush1.bf16.msra.mxu0 %v3055_v28  ;;  %609 = vmatprep.mubr.bf16.mxu0 %v4175_v0  ;;  %v3562_v54 = vld [vmem:[#allocation8 + $0xa4] ss:$16 sps:$4 sm:$0xff]   ;;  %v3557_v55 = vld [vmem:[#allocation8 + $0x88] ss:$16 sps:$4 sm:$0xff]   ;;  %v3565_v56 = vld [vmem:[#allocation8 + $0xac] ss:$16 sps:$4 sm:$0xff]  }
  0xab   : > { %579 = vmatprep.subr.bf16.mxu0 %v3064_v30  ;;  %619 = vmatpush1.bf16.msra.mxu1 %v3057_v31  ;;  %v3560_v57 = vld [vmem:[#allocation8 + $0xa0] ss:$16 sps:$4 sm:$0xff]   ;;  %v3568_v58 = vld [vmem:[#allocation8 + $0xc4] ss:$16 sps:$4 sm:$0xff]   ;;  %v3563_v59 = vld [vmem:[#allocation8 + $0xa8] ss:$16 sps:$4 sm:$0xff]  }
  0xac   : > { %650 = vmatprep.mubr.bf16.mxu1 %v4175_v0  ;;  %620 = vmatprep.subr.bf16.mxu1 %v3066_v32  ;;  %v3571_v60 = vld [vmem:[#allocation8 + $0xcc] ss:$16 sps:$4 sm:$0xff]   ;;  %v3566_v61 = vld [vmem:[#allocation8 + $0xc0] ss:$16 sps:$4 sm:$0xff]   ;;  %v3569_v62 = vld [vmem:[#allocation8 + $0xc8] ss:$16 sps:$4 sm:$0xff]  }
  0xad   : > { %v3574_v63 = vld [vmem:[#allocation8 + $0xe4] ss:$16 sps:$4 sm:$0xff]   ;;  %v3572_v0 = vld [vmem:[#allocation8 + $0xe0] ss:$16 sps:$4 sm:$0xff]   ;;  %v3577_v1 = vld [vmem:[#allocation8 + $0xec] ss:$16 sps:$4 sm:$0xff]  }
  0xae   : > { %580 = vmatpush1.bf16.msra.mxu0 %v3063_v33  ;;  %v3580_v2 = vld [vmem:[#allocation8 + $0x104] ss:$16 sps:$4 sm:$0xff]   ;;  %v3575_v3 = vld [vmem:[#allocation8 + $0xe8] ss:$16 sps:$4 sm:$0xff]   ;;  %v3583_v4 = vld [vmem:[#allocation8 + $0x10c] ss:$16 sps:$4 sm:$0xff]  }
  0xaf   : > { %2233 = vmatprep.subr.bf16.mxu0 %v3532_v34  ;;  %621 = vmatpush1.bf16.msra.mxu1 %v3065_v35  ;;  %v3578_v5 = vld [vmem:[#allocation8 + $0x100] ss:$16 sps:$4 sm:$0xff]   ;;  %v3586_v6 = vld [vmem:[#allocation8 + $0x124] ss:$16 sps:$4 sm:$0xff]   ;;  %v3581_v7 = vld [vmem:[#allocation8 + $0x108] ss:$16 sps:$4 sm:$0xff]  }
  0xb0   : > { %2397 = vmatprep.subr.bf16.mxu1 %v3535_v36  ;;  %v3589_v8 = vld [vmem:[#allocation8 + $0x12c] ss:$16 sps:$4 sm:$0xff]   ;;  %v3584_v9 = vld [vmem:[#allocation8 + $0x120] ss:$16 sps:$4 sm:$0xff]   ;;  %v3592_v10 = vld [vmem:[#allocation8 + $0x144] ss:$16 sps:$4 sm:$0xff]  }
  0xb1   : > { %3069 = vmatmul.mubr.msk.bf16.vlgmr.msra.gmra.mrb[4].mxu0 %vm491_vm0, %v352_v25  ;;  %v3587_v11 = vld [vmem:[#allocation8 + $0x128] ss:$16 sps:$4 sm:$0xff]   ;;  %v3595_v12 = vld [vmem:[#allocation8 + $0x14c] ss:$16 sps:$4 sm:$0xff]   ;;  %v3590_v13 = vld [vmem:[#allocation8 + $0x140] ss:$16 sps:$4 sm:$0xff]  }
  0xb2   : > { %2234 = vmatpush1.bf16.msra.mxu0 %v3530_v37  ;;  %3070 = vmatmul.mubr.msk.bf16.vlgmr.msra.gmra.mrb[4].mxu1 %vm491_vm0, %v352_v25  ;;  %v3598_v14 = vld [vmem:[#allocation8 + $0x164] ss:$16 sps:$4 sm:$0xff]   ;;  %v3593_v15 = vld [vmem:[#allocation8 + $0x148] ss:$16 sps:$4 sm:$0xff]   ;;  %v3601_v16 = vld [vmem:[#allocation8 + $0x16c] ss:$16 sps:$4 sm:$0xff]   ;;  %v371_v37 = vlaneseq }
  0xb3   : > { %2235 = vmatprep.subr.bf16.mxu0 %v3538_v38  ;;  %2398 = vmatpush1.bf16.msra.mxu1 %v3533_v39  ;;  %v3596_v17 = vld [vmem:[#allocation8 + $0x160] ss:$16 sps:$4 sm:$0xff]   ;;  %v3604_v18 = vld [vmem:[#allocation8 + $0x184] ss:$16 sps:$4 sm:$0xff]   ;;  %v3599_v19 = vld [vmem:[#allocation8 + $0x168] ss:$16 sps:$4 sm:$0xff]  }
  0xb4   : > { %2399 = vmatprep.subr.bf16.mxu1 %v3541_v40  ;;  %v3607_v20 = vld [vmem:[#allocation8 + $0x18c] ss:$16 sps:$4 sm:$0xff]   ;;  %v3602_v21 = vld [vmem:[#allocation8 + $0x180] ss:$16 sps:$4 sm:$0xff]   ;;  %v3610_v22 = vld [vmem:[#allocation8 + $0x1a4] ss:$16 sps:$4 sm:$0xff]  }
  0xb5   : > { %v3605_v23 = vld [vmem:[#allocation8 + $0x188] ss:$16 sps:$4 sm:$0xff]   ;;  %v3613_v24 = vld [vmem:[#allocation8 + $0x1ac] ss:$16 sps:$4 sm:$0xff]   ;;  %v3608_v25 = vld [vmem:[#allocation8 + $0x1a0] ss:$16 sps:$4 sm:$0xff]  }
  0xb6   : > { %2236 = vmatpush1.bf16.msra.mxu0 %v3536_v41  ;;  %v3611_v26 = vld [vmem:[#allocation8 + $0x1a8] ss:$16 sps:$4 sm:$0xff]   ;;  %v3616_v27 = vld [vmem:[#allocation8 + $0x1c4] ss:$16 sps:$4 sm:$0xff]   ;;  %v3619_v28 = vld [vmem:[#allocation8 + $0x1cc] ss:$16 sps:$4 sm:$0xff]  }
  0xb7   : > { %2237 = vmatprep.subr.bf16.mxu0 %v3544_v42  ;;  %2400 = vmatpush1.bf16.msra.mxu1 %v3539_v43  ;;  %v3614_v29 = vld [vmem:[#allocation8 + $0x1c0] ss:$16 sps:$4 sm:$0xff]   ;;  %v3617_v30 = vld [vmem:[#allocation8 + $0x1c8] ss:$16 sps:$4 sm:$0xff]   ;;  %v3622_v31 = vld [vmem:[#allocation8 + $0x1e4] ss:$16 sps:$4 sm:$0xff]  }
  0xb8   : > { %2401 = vmatprep.subr.bf16.mxu1 %v3547_v44  ;;  %v3625_v32 = vld [vmem:[#allocation8 + $0x1ec] ss:$16 sps:$4 sm:$0xff]   ;;  %v3620_v33 = vld [vmem:[#allocation8 + $0x1e0] ss:$16 sps:$4 sm:$0xff]   ;;  %v3623_v34 = vld [vmem:[#allocation8 + $0x1e8] ss:$16 sps:$4 sm:$0xff]  }
  0xb9   : > { %v3628_v35 = vld [vmem:[#allocation8 + $0x204] ss:$16 sps:$4 sm:$0xff]   ;;  %v3631_v36 = vld [vmem:[#allocation8 + $0x20c] ss:$16 sps:$4 sm:$0xff]   ;;  %v4451_v38 = vshrl.u32 %v371_v37, 7 }
  0xba   : > { %2238 = vmatpush1.bf16.msra.mxu0 %v3542_v45  ;;  %v4454_v40 = vld [vmem:[#allocation7] sm:$0xff]  ;;  %v3676_v37 = vld [vmem:[#allocation8 + $0x304] ss:$16 sps:$4 sm:$0xff]  }
  0xbb   : > { %2239 = vmatprep.subr.bf16.mxu0 %v3550_v46  ;;  %2402 = vmatpush1.bf16.msra.mxu1 %v3545_v47  ;;  %v373_v39 = vsub.s32 0, %v4451_v38  ;;  %v377_v41 = vsub.s32 1, %v4451_v38  ;;  %v385_v42 = vsub.s32 3, %v4451_v38 }
  0xbc   : > { %2403 = vmatprep.subr.bf16.mxu1 %v3553_v48 }
  0xbd   : > { %v374_v43 = vrot.slane %v4454_v40, %v373_v39  ;;  %v378_v44 = vrot.slane %v4454_v40, %v377_v41  ;;  %v386_v46 = vrot.slane %v4454_v40, %v385_v42 }
  0xbe   : > { %2240 = vmatpush1.bf16.msra.mxu0 %v3548_v49 }
  0xbf   : > { %2241 = vmatprep.subr.bf16.mxu0 %v3556_v50  ;;  %2404 = vmatpush1.bf16.msra.mxu1 %v3551_v51 }
  0xc0   : > { %2405 = vmatprep.subr.bf16.mxu1 %v3559_v52 }
  0xc2   : > { %2242 = vmatpush1.bf16.msra.mxu0 %v3554_v53 }
  0xc3   : > { %2243 = vmatprep.subr.bf16.mxu0 %v3562_v54  ;;  %2406 = vmatpush1.bf16.msra.mxu1 %v3557_v55 }
  0xc4   : > { %2407 = vmatprep.subr.bf16.mxu1 %v3565_v56 }
  0xc6   : > { %2244 = vmatpush1.bf16.msra.mxu0 %v3560_v57 }
  0xc7   : > { %2245 = vmatprep.subr.bf16.mxu0 %v3568_v58  ;;  %2408 = vmatpush1.bf16.msra.mxu1 %v3563_v59 }
  0xc8   : > { %2409 = vmatprep.subr.bf16.mxu1 %v3571_v60  ;;  %v3626_v60 = vld [vmem:[#allocation8 + $0x200] ss:$16 sps:$4 sm:$0xff]  }
  0xca   : > { %2246 = vmatpush1.bf16.msra.mxu0 %v3566_v61  ;;  %v3629_v61 = vld [vmem:[#allocation8 + $0x208] ss:$16 sps:$4 sm:$0xff]  }
  0xcb   : > { %2247 = vmatprep.subr.bf16.mxu0 %v3574_v63  ;;  %2410 = vmatpush1.bf16.msra.mxu1 %v3569_v62 }
  0xcc   : > { %2411 = vmatprep.subr.bf16.mxu1 %v3577_v1  ;;  %v3637_v1 = vld [vmem:[#allocation8 + $0x22c] ss:$16 sps:$4 sm:$0xff]  }
  0xce   : > { %2248 = vmatpush1.bf16.msra.mxu0 %v3572_v0  ;;  %v3634_v0 = vld [vmem:[#allocation8 + $0x224] ss:$16 sps:$4 sm:$0xff]  }
  0xcf   : > { %2249 = vmatprep.subr.bf16.mxu0 %v3580_v2  ;;  %2412 = vmatpush1.bf16.msra.mxu1 %v3575_v3 }
  0xd0   : > { %2413 = vmatprep.subr.bf16.mxu1 %v3583_v4 }
  0xd2   : > { %2250 = vmatpush1.bf16.msra.mxu0 %v3578_v5  ;;  %v3632_v5 = vld [vmem:[#allocation8 + $0x220] ss:$16 sps:$4 sm:$0xff]  }
  0xd3   : > { %2251 = vmatprep.subr.bf16.mxu0 %v3586_v6  ;;  %2414 = vmatpush1.bf16.msra.mxu1 %v3581_v7  ;;  %v3635_v6 = vld [vmem:[#allocation8 + $0x228] ss:$16 sps:$4 sm:$0xff]  }
  0xd4   : > { %2415 = vmatprep.subr.bf16.mxu1 %v3589_v8  ;;  %v3640_v8 = vld [vmem:[#allocation8 + $0x244] ss:$16 sps:$4 sm:$0xff]  }
  0xd6   : > { %2252 = vmatpush1.bf16.msra.mxu0 %v3584_v9  ;;  %v3643_v9 = vld [vmem:[#allocation8 + $0x24c] ss:$16 sps:$4 sm:$0xff]  }
  0xd7   : > { %2253 = vmatprep.subr.bf16.mxu0 %v3592_v10  ;;  %2416 = vmatpush1.bf16.msra.mxu1 %v3587_v11  ;;  %v3638_v11 = vld [vmem:[#allocation8 + $0x240] ss:$16 sps:$4 sm:$0xff]  }
  0xd8   : > { %2417 = vmatprep.subr.bf16.mxu1 %v3595_v12  ;;  %v3641_v12 = vld [vmem:[#allocation8 + $0x248] ss:$16 sps:$4 sm:$0xff]  }
  0xda   : > { %2254 = vmatpush1.bf16.msra.mxu0 %v3590_v13  ;;  %v3646_v13 = vld [vmem:[#allocation8 + $0x264] ss:$16 sps:$4 sm:$0xff]  }
  0xdb   : > { %2255 = vmatprep.subr.bf16.mxu0 %v3598_v14  ;;  %2418 = vmatpush1.bf16.msra.mxu1 %v3593_v15  ;;  %v3649_v14 = vld [vmem:[#allocation8 + $0x26c] ss:$16 sps:$4 sm:$0xff]   ;;  %v3644_v15 = vld [vmem:[#allocation8 + $0x260] ss:$16 sps:$4 sm:$0xff]  }
  0xdc   : > { %2419 = vmatprep.subr.bf16.mxu1 %v3601_v16  ;;  %v3647_v16 = vld [vmem:[#allocation8 + $0x268] ss:$16 sps:$4 sm:$0xff]  }
  0xde   : > { %2256 = vmatpush1.bf16.msra.mxu0 %v3596_v17  ;;  %v3652_v17 = vld [vmem:[#allocation8 + $0x284] ss:$16 sps:$4 sm:$0xff]  }
  0xdf   : > { %2257 = vmatprep.subr.bf16.mxu0 %v3604_v18  ;;  %2420 = vmatpush1.bf16.msra.mxu1 %v3599_v19  ;;  %v3655_v18 = vld [vmem:[#allocation8 + $0x28c] ss:$16 sps:$4 sm:$0xff]   ;;  %v3650_v19 = vld [vmem:[#allocation8 + $0x280] ss:$16 sps:$4 sm:$0xff]  }
  0xe0   : > { %2421 = vmatprep.subr.bf16.mxu1 %v3607_v20  ;;  %v3653_v20 = vld [vmem:[#allocation8 + $0x288] ss:$16 sps:$4 sm:$0xff]  }
  0xe2   : > { %2258 = vmatpush1.bf16.msra.mxu0 %v3602_v21  ;;  %v3658_v21 = vld [vmem:[#allocation8 + $0x2a4] ss:$16 sps:$4 sm:$0xff]  }
  0xe3   : > { %2259 = vmatprep.subr.bf16.mxu0 %v3610_v22  ;;  %2422 = vmatpush1.bf16.msra.mxu1 %v3605_v23  ;;  %v3661_v22 = vld [vmem:[#allocation8 + $0x2ac] ss:$16 sps:$4 sm:$0xff]   ;;  %v3656_v23 = vld [vmem:[#allocation8 + $0x2a0] ss:$16 sps:$4 sm:$0xff]  }
  0xe4   : > { %2423 = vmatprep.subr.bf16.mxu1 %v3613_v24  ;;  %v3659_v24 = vld [vmem:[#allocation8 + $0x2a8] ss:$16 sps:$4 sm:$0xff]  }
  0xe6   : > { %2260 = vmatpush1.bf16.msra.mxu0 %v3608_v25 }
  0xe7   : > { %2424 = vmatpush1.bf16.msra.mxu1 %v3611_v26  ;;  %2261 = vmatprep.subr.bf16.mxu0 %v3616_v27  ;;  %v3664_v26 = vld [vmem:[#allocation8 + $0x2c4] ss:$16 sps:$4 sm:$0xff]   ;;  %v3667_v27 = vld [vmem:[#allocation8 + $0x2cc] ss:$16 sps:$4 sm:$0xff]  }
  0xe8   : > { %2425 = vmatprep.subr.bf16.mxu1 %v3619_v28 }
  0xea   : > { %2262 = vmatpush1.bf16.msra.mxu0 %v3614_v29 }
  0xeb   : > { %2426 = vmatpush1.bf16.msra.mxu1 %v3617_v30  ;;  %2263 = vmatprep.subr.bf16.mxu0 %v3622_v31  ;;  %v3662_v31 = vld [vmem:[#allocation8 + $0x2c0] ss:$16 sps:$4 sm:$0xff]  }
  0xec   : > { %2427 = vmatprep.subr.bf16.mxu1 %v3625_v32  ;;  %v3665_v32 = vld [vmem:[#allocation8 + $0x2c8] ss:$16 sps:$4 sm:$0xff]  }
  0xee   : > { %2264 = vmatpush1.bf16.msra.mxu0 %v3620_v33  ;;  %v3670_v33 = vld [vmem:[#allocation8 + $0x2e4] ss:$16 sps:$4 sm:$0xff]  }
  0xef   : > { %2428 = vmatpush1.bf16.msra.mxu1 %v3623_v34  ;;  %2274 = vmatprep.subr.bf16.mxu0 %v3628_v35  ;;  %v3673_v34 = vld [vmem:[#allocation8 + $0x2ec] ss:$16 sps:$4 sm:$0xff]   ;;  %v3668_v35 = vld [vmem:[#allocation8 + $0x2e0] ss:$16 sps:$4 sm:$0xff]  }
  0xf0   : > { %2438 = vmatprep.subr.bf16.mxu1 %v3631_v36  ;;  %v3671_v36 = vld [vmem:[#allocation8 + $0x2e8] ss:$16 sps:$4 sm:$0xff]  }
 0x17c   : > { %v529_v45 = vpop.f32.mrb[0].mxu0  ;;  %v4467_v51 = vpop.f32.mrb[0].mxu1 }
 0x17d   : > { %v530_v47 = vadd.f32 %v529_v45, %v374_v43  ;;  %v531_v48 = vpop.f32.mrb[1].mxu0  ;;  %v572_v54 = vpop.f32.mrb[1].mxu1  ;;  %v3679_v43 = vld [vmem:[#allocation8 + $0x30c] ss:$16 sps:$4 sm:$0xff]   ;;  %v3677_v45 = vld [vmem:[#allocation8 + $0x308] ss:$16 sps:$4 sm:$0xff]  }
 0x17e   : > { %v532_v49 = vadd.f32 %v531_v48, %v378_v44  ;;  %v533_v50 = vpop.f32.mrb[2].mxu0  ;;  %v573_v56 = vadd.f32 %v572_v54, %v386_v46  ;;  %v574_v57 = vpop.f32.mrb[2].mxu1  ;;  %v3674_v44 = vld [vmem:[#allocation8 + $0x300] ss:$16 sps:$4 sm:$0xff]   ;;  %v3682_v46 = vld [vmem:[#allocation8 + $0x324] ss:$16 sps:$4 sm:$0xff]  }
 0x17f   : > { %v659_v52 = vmax.f32 %v530_v47, 0.0  ;;  %v534_v53 = vpop.f32.mrb[3].mxu0  ;;  %v575_v58 = vpop.f32.mrb[3].mxu1  ;;  %v3685_v47 = vld [vmem:[#allocation8 + $0x32c] ss:$16 sps:$4 sm:$0xff]  }
 0x180   : > { %v660_v55 = vmax.f32 %v532_v49, 0.0  ;;  %v662_v62 = vmax.f32 %v573_v56, 0.0  ;;  %v3680_v48 = vld [vmem:[#allocation8 + $0x320] ss:$16 sps:$4 sm:$0xff]   ;;  %v3683_v49 = vld [vmem:[#allocation8 + $0x328] ss:$16 sps:$4 sm:$0xff]  }
 0x181   : > { %v667_v63 = vpack.c.bf16 %v659_v52, %v659_v52  ;;  %v3688_v50 = vld [vmem:[#allocation8 + $0x344] ss:$16 sps:$4 sm:$0xff]   ;;  %v3691_v52 = vld [vmem:[#allocation8 + $0x34c] ss:$16 sps:$4 sm:$0xff]   ;;  %v3686_v53 = vld [vmem:[#allocation8 + $0x340] ss:$16 sps:$4 sm:$0xff]  }
 0x182   : > { %v668_v59 = vpack.c.bf16 %v660_v55, %v660_v55  ;;  %v670_v2 = vpack.c.bf16 %v662_v62, %v662_v62  ;;  %v3689_v54 = vld [vmem:[#allocation8 + $0x348] ss:$16 sps:$4 sm:$0xff]   ;;  %v3694_v55 = vld [vmem:[#allocation8 + $0x364] ss:$16 sps:$4 sm:$0xff]   ;;  %v3697_v56 = vld [vmem:[#allocation8 + $0x36c] ss:$16 sps:$4 sm:$0xff]  }
 0x183   : > { %v3692_v57 = vld [vmem:[#allocation8 + $0x360] ss:$16 sps:$4 sm:$0xff]   ;;  %v3695_v58 = vld [vmem:[#allocation8 + $0x368] ss:$16 sps:$4 sm:$0xff]  }
 0x184   : > { %2265 = vmatprep.mubr.bf16.mxu0 %v668_v59  ;;  %2429 = vmatprep.mubr.bf16.mxu1 %v668_v59  ;;  %v4469_v3 = vpop.f32.mrb[4].mxu0  ;;  %v3700_v59 = vld [vmem:[#allocation8 + $0x384] ss:$16 sps:$4 sm:$0xff]   ;;  %v3698_v62 = vld [vmem:[#allocation8 + $0x380] ss:$16 sps:$4 sm:$0xff]  }
 0x185   : > { %2266 = vmatmul.mubr.bf16.vlgmr.msra.gmra.mrb[8].mxu0 %v667_v63  ;;  %2430 = vmatmul.mubr.bf16.vlgmr.msra.gmra.mrb[8].mxu1 %v667_v63  ;;  %v4471_v4 = vpop.f32.mrb[5].mxu0  ;;  %v4473_v25 = vpop.f32.mrb[4].mxu1  ;;  %v3701_v63 = vld [vmem:[#allocation8 + $0x388] ss:$16 sps:$4 sm:$0xff]  }
 0x186   : > { %2275 = vmatpush1.bf16.msra.mxu0 %v3626_v60  ;;  %2439 = vmatpush1.bf16.msra.mxu1 %v3629_v61  ;;  %v615_v7 = vpop.f32.mrb[6].mxu0  ;;  %v4475_v28 = vpop.f32.mrb[5].mxu1  ;;  %v3703_v60 = vld [vmem:[#allocation8 + $0x38c] ss:$16 sps:$4 sm:$0xff]   ;;  %v381_v61 = vsub.s32 2, %v4451_v38 }
 0x187   : > { %2276 = vmatprep.subr.bf16.mxu0 %v3634_v0  ;;  %2440 = vmatprep.subr.bf16.mxu1 %v3637_v1  ;;  %v616_v10 = vpop.f32.mrb[7].mxu0  ;;  %v656_v29 = vpop.f32.mrb[6].mxu1  ;;  %v3706_v0 = vld [vmem:[#allocation8 + $0x3a4] ss:$16 sps:$4 sm:$0xff]   ;;  %v3709_v1 = vld [vmem:[#allocation8 + $0x3ac] ss:$16 sps:$4 sm:$0xff]  }
 0x188   : > { %2306 = vmatprep.mubr.bf16.mxu0 %v670_v2  ;;  %2470 = vmatprep.mubr.bf16.mxu1 %v670_v2  ;;  %v657_v30 = vpop.f32.mrb[7].mxu1  ;;  %v393_v2 = vsub.s32 5, %v4451_v38  ;;  %v3707_v7 = vld [vmem:[#allocation8 + $0x3a8] ss:$16 sps:$4 sm:$0xff]   ;;  %v3728_v29 = vld [vmem:[#allocation8 + $0x420] ss:$16 sps:$4 sm:$0xff]  }
 0x189   : > { %v3731_v30 = vld [vmem:[#allocation8 + $0x428] ss:$16 sps:$4 sm:$0xff]  }
 0x18a   : > { %2277 = vmatpush1.bf16.msra.mxu0 %v3632_v5  ;;  %2441 = vmatpush1.bf16.msra.mxu1 %v3635_v6  ;;  %v382_v5 = vrot.slane %v4454_v40, %v381_v61  ;;  %v3704_v6 = vld [vmem:[#allocation8 + $0x3a0] ss:$16 sps:$4 sm:$0xff]   ;;  %v394_v10 = vrot.slane %v4454_v40, %v393_v2  ;;  %v3778_v2 = vld [vmem:[#allocation8 + $0x524] ss:$16 sps:$4 sm:$0xff]  }
 0x18b   : > { %2278 = vmatprep.subr.bf16.mxu0 %v3640_v8  ;;  %2442 = vmatprep.subr.bf16.mxu1 %v3643_v9  ;;  %v3712_v8 = vld [vmem:[#allocation8 + $0x3c4] ss:$16 sps:$4 sm:$0xff]   ;;  %v3715_v9 = vld [vmem:[#allocation8 + $0x3cc] ss:$16 sps:$4 sm:$0xff]  }
 0x18e   : > { %2279 = vmatpush1.bf16.msra.mxu0 %v3638_v11  ;;  %2443 = vmatpush1.bf16.msra.mxu1 %v3641_v12  ;;  %v571_v11 = vadd.f32 %v4467_v51, %v382_v5  ;;  %v3710_v12 = vld [vmem:[#allocation8 + $0x3c0] ss:$16 sps:$4 sm:$0xff]   ;;  %v3781_v5 = vld [vmem:[#allocation8 + $0x52c] ss:$16 sps:$4 sm:$0xff]  }
 0x18f   : > { %2280 = vmatprep.subr.bf16.mxu0 %v3646_v13  ;;  %2444 = vmatprep.subr.bf16.mxu1 %v3649_v14  ;;  %v3713_v13 = vld [vmem:[#allocation8 + $0x3c8] ss:$16 sps:$4 sm:$0xff]   ;;  %v3718_v14 = vld [vmem:[#allocation8 + $0x3e4] ss:$16 sps:$4 sm:$0xff]  }
 0x192   : > { %2281 = vmatpush1.bf16.msra.mxu0 %v3644_v15  ;;  %2445 = vmatpush1.bf16.msra.mxu1 %v3647_v16  ;;  %v3721_v15 = vld [vmem:[#allocation8 + $0x3ec] ss:$16 sps:$4 sm:$0xff]   ;;  %v614_v16 = vadd.f32 %v4471_v4, %v394_v10  ;;  %v3782_v10 = vld [vmem:[#allocation8 + $0x540] ss:$16 sps:$4 sm:$0xff]  }
 0x193   : > { %2282 = vmatprep.subr.bf16.mxu0 %v3652_v17  ;;  %2446 = vmatprep.subr.bf16.mxu1 %v3655_v18  ;;  %v661_v17 = vmax.f32 %v571_v11, 0.0  ;;  %v3716_v18 = vld [vmem:[#allocation8 + $0x3e0] ss:$16 sps:$4 sm:$0xff]   ;;  %v3785_v11 = vld [vmem:[#allocation8 + $0x548] ss:$16 sps:$4 sm:$0xff]  }
 0x194   : > { %v664_v51 = vmax.f32 %v614_v16, 0.0  ;;  %v3796_v16 = vld [vmem:[#allocation8 + $0x584] ss:$16 sps:$4 sm:$0xff]  }
 0x196   : > { %2283 = vmatpush1.bf16.msra.mxu0 %v3650_v19  ;;  %2447 = vmatpush1.bf16.msra.mxu1 %v3653_v20  ;;  %v3719_v19 = vld [vmem:[#allocation8 + $0x3e8] ss:$16 sps:$4 sm:$0xff]   ;;  %v3724_v20 = vld [vmem:[#allocation8 + $0x404] ss:$16 sps:$4 sm:$0xff]   ;;  %v672_v4 = vpack.c.bf16 %v664_v51, %v664_v51  ;;  %v3805_v51 = vld [vmem:[#allocation8 + $0x5ac] ss:$16 sps:$4 sm:$0xff]  }
 0x197   : > { %2284 = vmatprep.subr.bf16.mxu0 %v3658_v21  ;;  %2448 = vmatprep.subr.bf16.mxu1 %v3661_v22  ;;  %v3727_v21 = vld [vmem:[#allocation8 + $0x40c] ss:$16 sps:$4 sm:$0xff]   ;;  %v669_v22 = vpack.c.bf16 %v661_v17, %v661_v17 }
 0x198   : > { %v3799_v17 = vld [vmem:[#allocation8 + $0x58c] ss:$16 sps:$4 sm:$0xff]  }
 0x19a   : > { %2285 = vmatpush1.bf16.msra.mxu0 %v3656_v23  ;;  %2449 = vmatpush1.bf16.msra.mxu1 %v3659_v24  ;;  %v3722_v23 = vld [vmem:[#allocation8 + $0x400] ss:$16 sps:$4 sm:$0xff]   ;;  %v3725_v24 = vld [vmem:[#allocation8 + $0x408] ss:$16 sps:$4 sm:$0xff]  }
 0x19b   : > { %2286 = vmatprep.subr.bf16.mxu0 %v3664_v26  ;;  %2450 = vmatprep.subr.bf16.mxu1 %v3667_v27  ;;  %v3730_v26 = vld [vmem:[#allocation8 + $0x424] ss:$16 sps:$4 sm:$0xff]   ;;  %v3733_v27 = vld [vmem:[#allocation8 + $0x42c] ss:$16 sps:$4 sm:$0xff]  }
 0x19e   : > { %2287 = vmatpush1.bf16.msra.mxu0 %v3662_v31  ;;  %2451 = vmatpush1.bf16.msra.mxu1 %v3665_v32  ;;  %v3736_v31 = vld [vmem:[#allocation8 + $0x444] ss:$16 sps:$4 sm:$0xff]   ;;  %v3739_v32 = vld [vmem:[#allocation8 + $0x44c] ss:$16 sps:$4 sm:$0xff]  }
 0x19f   : > { %2288 = vmatprep.subr.bf16.mxu0 %v3670_v33  ;;  %2452 = vmatprep.subr.bf16.mxu1 %v3673_v34  ;;  %v3734_v33 = vld [vmem:[#allocation8 + $0x440] ss:$16 sps:$4 sm:$0xff]   ;;  %v3737_v34 = vld [vmem:[#allocation8 + $0x448] ss:$16 sps:$4 sm:$0xff]  }
 0x1a2   : > { %2289 = vmatpush1.bf16.msra.mxu0 %v3668_v35  ;;  %2453 = vmatpush1.bf16.msra.mxu1 %v3671_v36  ;;  %v3742_v35 = vld [vmem:[#allocation8 + $0x464] ss:$16 sps:$4 sm:$0xff]   ;;  %v3745_v36 = vld [vmem:[#allocation8 + $0x46c] ss:$16 sps:$4 sm:$0xff]  }
 0x1a3   : > { %2290 = vmatprep.subr.bf16.mxu0 %v3676_v37  ;;  %2454 = vmatprep.subr.bf16.mxu1 %v3679_v43  ;;  %v3740_v37 = vld [vmem:[#allocation8 + $0x460] ss:$16 sps:$4 sm:$0xff]   ;;  %v3743_v43 = vld [vmem:[#allocation8 + $0x468] ss:$16 sps:$4 sm:$0xff]  }
 0x1a6   : > { %2291 = vmatpush1.bf16.msra.mxu0 %v3674_v44  ;;  %2455 = vmatpush1.bf16.msra.mxu1 %v3677_v45  ;;  %v3748_v44 = vld [vmem:[#allocation8 + $0x484] ss:$16 sps:$4 sm:$0xff]   ;;  %v3751_v45 = vld [vmem:[#allocation8 + $0x48c] ss:$16 sps:$4 sm:$0xff]  }
 0x1a7   : > { %2292 = vmatprep.subr.bf16.mxu0 %v3682_v46  ;;  %2456 = vmatprep.subr.bf16.mxu1 %v3685_v47  ;;  %v3746_v46 = vld [vmem:[#allocation8 + $0x480] ss:$16 sps:$4 sm:$0xff]   ;;  %v3749_v47 = vld [vmem:[#allocation8 + $0x488] ss:$16 sps:$4 sm:$0xff]  }
 0x1aa   : > { %2293 = vmatpush1.bf16.msra.mxu0 %v3680_v48  ;;  %2457 = vmatpush1.bf16.msra.mxu1 %v3683_v49  ;;  %v3754_v48 = vld [vmem:[#allocation8 + $0x4a4] ss:$16 sps:$4 sm:$0xff]   ;;  %v3757_v49 = vld [vmem:[#allocation8 + $0x4ac] ss:$16 sps:$4 sm:$0xff]  }
 0x1ab   : > { %2294 = vmatprep.subr.bf16.mxu0 %v3688_v50  ;;  %2458 = vmatprep.subr.bf16.mxu1 %v3691_v52  ;;  %v3752_v50 = vld [vmem:[#allocation8 + $0x4a0] ss:$16 sps:$4 sm:$0xff]   ;;  %v3755_v52 = vld [vmem:[#allocation8 + $0x4a8] ss:$16 sps:$4 sm:$0xff]  }
 0x1ae   : > { %2295 = vmatpush1.bf16.msra.mxu0 %v3686_v53  ;;  %2459 = vmatpush1.bf16.msra.mxu1 %v3689_v54  ;;  %v3760_v53 = vld [vmem:[#allocation8 + $0x4c4] ss:$16 sps:$4 sm:$0xff]   ;;  %v3763_v54 = vld [vmem:[#allocation8 + $0x4cc] ss:$16 sps:$4 sm:$0xff]  }
 0x1af   : > { %2296 = vmatprep.subr.bf16.mxu0 %v3694_v55  ;;  %2460 = vmatprep.subr.bf16.mxu1 %v3697_v56  ;;  %v3758_v55 = vld [vmem:[#allocation8 + $0x4c0] ss:$16 sps:$4 sm:$0xff]   ;;  %v3761_v56 = vld [vmem:[#allocation8 + $0x4c8] ss:$16 sps:$4 sm:$0xff]  }
 0x1b2   : > { %2297 = vmatpush1.bf16.msra.mxu0 %v3692_v57  ;;  %2461 = vmatpush1.bf16.msra.mxu1 %v3695_v58  ;;  %v3766_v57 = vld [vmem:[#allocation8 + $0x4e4] ss:$16 sps:$4 sm:$0xff]   ;;  %v3769_v58 = vld [vmem:[#allocation8 + $0x4ec] ss:$16 sps:$4 sm:$0xff]  }
 0x1b3   : > { %2298 = vmatprep.subr.bf16.mxu0 %v3700_v59  ;;  %2462 = vmatprep.subr.bf16.mxu1 %v3703_v60  ;;  %v3764_v59 = vld [vmem:[#allocation8 + $0x4e0] ss:$16 sps:$4 sm:$0xff]   ;;  %v3767_v60 = vld [vmem:[#allocation8 + $0x4e8] ss:$16 sps:$4 sm:$0xff]  }
 0x1b6   : > { %2299 = vmatpush1.bf16.msra.mxu0 %v3698_v62  ;;  %2463 = vmatpush1.bf16.msra.mxu1 %v3701_v63  ;;  %v3772_v62 = vld [vmem:[#allocation8 + $0x504] ss:$16 sps:$4 sm:$0xff]   ;;  %v3775_v63 = vld [vmem:[#allocation8 + $0x50c] ss:$16 sps:$4 sm:$0xff]  }
 0x1b7   : > { %2300 = vmatprep.subr.bf16.mxu0 %v3706_v0  ;;  %2464 = vmatprep.subr.bf16.mxu1 %v3709_v1  ;;  %v3770_v0 = vld [vmem:[#allocation8 + $0x500] ss:$16 sps:$4 sm:$0xff]   ;;  %v3773_v1 = vld [vmem:[#allocation8 + $0x508] ss:$16 sps:$4 sm:$0xff]  }
 0x1ba   : > { %2301 = vmatpush1.bf16.msra.mxu0 %v3704_v6  ;;  %2465 = vmatpush1.bf16.msra.mxu1 %v3707_v7  ;;  %v3776_v6 = vld [vmem:[#allocation8 + $0x520] ss:$16 sps:$4 sm:$0xff]   ;;  %v3779_v7 = vld [vmem:[#allocation8 + $0x528] ss:$16 sps:$4 sm:$0xff]  }
 0x1bb   : > { %2302 = vmatprep.subr.bf16.mxu0 %v3712_v8  ;;  %2466 = vmatprep.subr.bf16.mxu1 %v3715_v9  ;;  %v3784_v8 = vld [vmem:[#allocation8 + $0x544] ss:$16 sps:$4 sm:$0xff]   ;;  %v3787_v9 = vld [vmem:[#allocation8 + $0x54c] ss:$16 sps:$4 sm:$0xff]  }
 0x1be   : > { %2303 = vmatpush1.bf16.msra.mxu0 %v3710_v12  ;;  %2467 = vmatpush1.bf16.msra.mxu1 %v3713_v13  ;;  %v3790_v12 = vld [vmem:[#allocation8 + $0x564] ss:$16 sps:$4 sm:$0xff]   ;;  %v3793_v13 = vld [vmem:[#allocation8 + $0x56c] ss:$16 sps:$4 sm:$0xff]  }
 0x1bf   : > { %2304 = vmatprep.subr.bf16.mxu0 %v3718_v14  ;;  %2468 = vmatprep.subr.bf16.mxu1 %v3721_v15  ;;  %v3788_v14 = vld [vmem:[#allocation8 + $0x560] ss:$16 sps:$4 sm:$0xff]   ;;  %v3791_v15 = vld [vmem:[#allocation8 + $0x568] ss:$16 sps:$4 sm:$0xff]  }
 0x1c2   : > { %2305 = vmatpush1.bf16.msra.mxu0 %v3716_v18  ;;  %2469 = vmatpush1.bf16.msra.mxu1 %v3719_v19  ;;  %v389_v18 = vsub.s32 4, %v4451_v38  ;;  %v3794_v19 = vld [vmem:[#allocation8 + $0x580] ss:$16 sps:$4 sm:$0xff]  }
 0x1c3   : > { %2315 = vmatprep.subr.bf16.mxu0 %v3724_v20  ;;  %2479 = vmatprep.subr.bf16.mxu1 %v3727_v21  ;;  %v3797_v20 = vld [vmem:[#allocation8 + $0x588] ss:$16 sps:$4 sm:$0xff]   ;;  %v3802_v21 = vld [vmem:[#allocation8 + $0x5a4] ss:$16 sps:$4 sm:$0xff]  }
 0x1c5   : > { %2307 = vmatmul.mubr.bf16.vlgmr.msra.gmra.mrb[8].mxu0 %v669_v22  ;;  %2471 = vmatmul.mubr.bf16.vlgmr.msra.gmra.mrb[8].mxu1 %v669_v22  ;;  %v401_v22 = vsub.s32 7, %v4451_v38 }
 0x1c6   : > { %2316 = vmatpush1.bf16.msra.mxu0 %v3722_v23  ;;  %2480 = vmatpush1.bf16.msra.mxu1 %v3725_v24  ;;  %v390_v23 = vrot.slane %v4454_v40, %v389_v18  ;;  %v3800_v24 = vld [vmem:[#allocation8 + $0x5a0] ss:$16 sps:$4 sm:$0xff]   ;;  %v3871_v18 = vld [vmem:[#allocation8 + $0x70c] ss:$16 sps:$4 sm:$0xff]  }
 0x1c7   : > { %2317 = vmatprep.subr.bf16.mxu0 %v3730_v26  ;;  %2481 = vmatprep.subr.bf16.mxu1 %v3733_v27  ;;  %v3803_v26 = vld [vmem:[#allocation8 + $0x5a8] ss:$16 sps:$4 sm:$0xff]   ;;  %v3808_v27 = vld [vmem:[#allocation8 + $0x5c4] ss:$16 sps:$4 sm:$0xff]  }
 0x1c8   : > { %2347 = vmatprep.mubr.bf16.mxu0 %v672_v4  ;;  %2511 = vmatprep.mubr.bf16.mxu1 %v672_v4  ;;  %v3811_v4 = vld [vmem:[#allocation8 + $0x5cc] ss:$16 sps:$4 sm:$0xff]  }
 0x1ca   : > { %2318 = vmatpush1.bf16.msra.mxu0 %v3728_v29  ;;  %2482 = vmatpush1.bf16.msra.mxu1 %v3731_v30  ;;  %v402_v29 = vrot.slane %v4454_v40, %v401_v22  ;;  %v612_v30 = vadd.f32 %v4469_v3, %v390_v23  ;;  %v3872_v22 = vld [vmem:[#allocation8 + $0x720] ss:$16 sps:$4 sm:$0xff]   ;;  %v3875_v23 = vld [vmem:[#allocation8 + $0x728] ss:$16 sps:$4 sm:$0xff]  }
 0x1cb   : > { %2319 = vmatprep.subr.bf16.mxu0 %v3736_v31  ;;  %2483 = vmatprep.subr.bf16.mxu1 %v3739_v32  ;;  %v3806_v31 = vld [vmem:[#allocation8 + $0x5c0] ss:$16 sps:$4 sm:$0xff]   ;;  %v3809_v32 = vld [vmem:[#allocation8 + $0x5c8] ss:$16 sps:$4 sm:$0xff]  }
 0x1ce   : > { %2320 = vmatpush1.bf16.msra.mxu0 %v3734_v33  ;;  %2484 = vmatpush1.bf16.msra.mxu1 %v3737_v34  ;;  %v3814_v33 = vld [vmem:[#allocation8 + $0x5e4] ss:$16 sps:$4 sm:$0xff]   ;;  %v3817_v34 = vld [vmem:[#allocation8 + $0x5ec] ss:$16 sps:$4 sm:$0xff]  }
 0x1cf   : > { %2321 = vmatprep.subr.bf16.mxu0 %v3742_v35  ;;  %2485 = vmatprep.subr.bf16.mxu1 %v3745_v36  ;;  %v655_v35 = vadd.f32 %v4475_v28, %v402_v29  ;;  %v663_v36 = vmax.f32 %v612_v30, 0.0  ;;  %v3886_v29 = vld [vmem:[#allocation8 + $0x764] ss:$16 sps:$4 sm:$0xff]   ;;  %v3889_v30 = vld [vmem:[#allocation8 + $0x76c] ss:$16 sps:$4 sm:$0xff]  }
 0x1d1   : > { %v666_v3 = vmax.f32 %v655_v35, 0.0  ;;  %v3890_v35 = vld [vmem:[#allocation8 + $0x780] ss:$16 sps:$4 sm:$0xff]  }
 0x1d2   : > { %2322 = vmatpush1.bf16.msra.mxu0 %v3740_v37  ;;  %2486 = vmatpush1.bf16.msra.mxu1 %v3743_v43  ;;  %v3812_v37 = vld [vmem:[#allocation8 + $0x5e0] ss:$16 sps:$4 sm:$0xff]   ;;  %v3815_v43 = vld [vmem:[#allocation8 + $0x5e8] ss:$16 sps:$4 sm:$0xff]  }
 0x1d3   : > { %2323 = vmatprep.subr.bf16.mxu0 %v3748_v44  ;;  %2487 = vmatprep.subr.bf16.mxu1 %v3751_v45  ;;  %v3820_v44 = vld [vmem:[#allocation8 + $0x604] ss:$16 sps:$4 sm:$0xff]   ;;  %v3823_v45 = vld [vmem:[#allocation8 + $0x60c] ss:$16 sps:$4 sm:$0xff]   ;;  %v674_v28 = vpack.c.bf16 %v666_v3, %v666_v3  ;;  %v3899_v3 = vld [vmem:[#allocation8 + $0x7a8] ss:$16 sps:$4 sm:$0xff]  }
 0x1d6   : > { %2324 = vmatpush1.bf16.msra.mxu0 %v3746_v46  ;;  %2488 = vmatpush1.bf16.msra.mxu1 %v3749_v47  ;;  %v671_v46 = vpack.c.bf16 %v663_v36, %v663_v36  ;;  %v3818_v47 = vld [vmem:[#allocation8 + $0x600] ss:$16 sps:$4 sm:$0xff]   ;;  %v3893_v36 = vld [vmem:[#allocation8 + $0x788] ss:$16 sps:$4 sm:$0xff]  }
 0x1d7   : > { %2325 = vmatprep.subr.bf16.mxu0 %v3754_v48  ;;  %2489 = vmatprep.subr.bf16.mxu1 %v3757_v49  ;;  %v3821_v48 = vld [vmem:[#allocation8 + $0x608] ss:$16 sps:$4 sm:$0xff]   ;;  %v3826_v49 = vld [vmem:[#allocation8 + $0x624] ss:$16 sps:$4 sm:$0xff]  }
 0x1da   : > { %2326 = vmatpush1.bf16.msra.mxu0 %v3752_v50  ;;  %2490 = vmatpush1.bf16.msra.mxu1 %v3755_v52  ;;  %v3829_v50 = vld [vmem:[#allocation8 + $0x62c] ss:$16 sps:$4 sm:$0xff]   ;;  %v3824_v52 = vld [vmem:[#allocation8 + $0x620] ss:$16 sps:$4 sm:$0xff]  }
 0x1db   : > { %2327 = vmatprep.subr.bf16.mxu0 %v3760_v53  ;;  %2491 = vmatprep.subr.bf16.mxu1 %v3763_v54  ;;  %v3827_v53 = vld [vmem:[#allocation8 + $0x628] ss:$16 sps:$4 sm:$0xff]   ;;  %v3832_v54 = vld [vmem:[#allocation8 + $0x644] ss:$16 sps:$4 sm:$0xff]  }
 0x1de   : > { %2328 = vmatpush1.bf16.msra.mxu0 %v3758_v55  ;;  %2492 = vmatpush1.bf16.msra.mxu1 %v3761_v56  ;;  %v3835_v55 = vld [vmem:[#allocation8 + $0x64c] ss:$16 sps:$4 sm:$0xff]   ;;  %v3830_v56 = vld [vmem:[#allocation8 + $0x640] ss:$16 sps:$4 sm:$0xff]  }
 0x1df   : > { %2329 = vmatprep.subr.bf16.mxu0 %v3766_v57  ;;  %2493 = vmatprep.subr.bf16.mxu1 %v3769_v58  ;;  %v3833_v57 = vld [vmem:[#allocation8 + $0x648] ss:$16 sps:$4 sm:$0xff]   ;;  %v3838_v58 = vld [vmem:[#allocation8 + $0x664] ss:$16 sps:$4 sm:$0xff]  }
 0x1e2   : > { %2330 = vmatpush1.bf16.msra.mxu0 %v3764_v59  ;;  %2494 = vmatpush1.bf16.msra.mxu1 %v3767_v60  ;;  %v3841_v59 = vld [vmem:[#allocation8 + $0x66c] ss:$16 sps:$4 sm:$0xff]   ;;  %v3836_v60 = vld [vmem:[#allocation8 + $0x660] ss:$16 sps:$4 sm:$0xff]  }
 0x1e3   : > { %2331 = vmatprep.subr.bf16.mxu0 %v3772_v62  ;;  %2495 = vmatprep.subr.bf16.mxu1 %v3775_v63  ;;  %v3839_v62 = vld [vmem:[#allocation8 + $0x668] ss:$16 sps:$4 sm:$0xff]   ;;  %v3844_v63 = vld [vmem:[#allocation8 + $0x684] ss:$16 sps:$4 sm:$0xff]  }
 0x1e6   : > { %2332 = vmatpush1.bf16.msra.mxu0 %v3770_v0  ;;  %2496 = vmatpush1.bf16.msra.mxu1 %v3773_v1  ;;  %v3847_v0 = vld [vmem:[#allocation8 + $0x68c] ss:$16 sps:$4 sm:$0xff]   ;;  %v3842_v1 = vld [vmem:[#allocation8 + $0x680] ss:$16 sps:$4 sm:$0xff]  }
 0x1e7   : > { %2333 = vmatprep.subr.bf16.mxu0 %v3778_v2  ;;  %2497 = vmatprep.subr.bf16.mxu1 %v3781_v5  ;;  %v3845_v2 = vld [vmem:[#allocation8 + $0x688] ss:$16 sps:$4 sm:$0xff]   ;;  %v3850_v5 = vld [vmem:[#allocation8 + $0x6a4] ss:$16 sps:$4 sm:$0xff]  }
 0x1ea   : > { %2334 = vmatpush1.bf16.msra.mxu0 %v3776_v6  ;;  %2498 = vmatpush1.bf16.msra.mxu1 %v3779_v7  ;;  %v3853_v6 = vld [vmem:[#allocation8 + $0x6ac] ss:$16 sps:$4 sm:$0xff]   ;;  %v3848_v7 = vld [vmem:[#allocation8 + $0x6a0] ss:$16 sps:$4 sm:$0xff]  }
 0x1eb   : > { %2335 = vmatprep.subr.bf16.mxu0 %v3784_v8  ;;  %2499 = vmatprep.subr.bf16.mxu1 %v3787_v9  ;;  %v3851_v8 = vld [vmem:[#allocation8 + $0x6a8] ss:$16 sps:$4 sm:$0xff]   ;;  %v3856_v9 = vld [vmem:[#allocation8 + $0x6c4] ss:$16 sps:$4 sm:$0xff]  }
 0x1ee   : > { %2336 = vmatpush1.bf16.msra.mxu0 %v3782_v10  ;;  %2500 = vmatpush1.bf16.msra.mxu1 %v3785_v11  ;;  %v3859_v10 = vld [vmem:[#allocation8 + $0x6cc] ss:$16 sps:$4 sm:$0xff]   ;;  %v3854_v11 = vld [vmem:[#allocation8 + $0x6c0] ss:$16 sps:$4 sm:$0xff]  }
 0x1ef   : > { %2337 = vmatprep.subr.bf16.mxu0 %v3790_v12  ;;  %2501 = vmatprep.subr.bf16.mxu1 %v3793_v13  ;;  %v3857_v12 = vld [vmem:[#allocation8 + $0x6c8] ss:$16 sps:$4 sm:$0xff]   ;;  %v3862_v13 = vld [vmem:[#allocation8 + $0x6e4] ss:$16 sps:$4 sm:$0xff]  }
 0x1f2   : > { %2338 = vmatpush1.bf16.msra.mxu0 %v3788_v14  ;;  %2502 = vmatpush1.bf16.msra.mxu1 %v3791_v15  ;;  %v3865_v14 = vld [vmem:[#allocation8 + $0x6ec] ss:$16 sps:$4 sm:$0xff]   ;;  %v3860_v15 = vld [vmem:[#allocation8 + $0x6e0] ss:$16 sps:$4 sm:$0xff]  }
 0x1f3   : > { %2339 = vmatprep.subr.bf16.mxu0 %v3796_v16  ;;  %2503 = vmatprep.subr.bf16.mxu1 %v3799_v17  ;;  %v3863_v16 = vld [vmem:[#allocation8 + $0x6e8] ss:$16 sps:$4 sm:$0xff]   ;;  %v3868_v17 = vld [vmem:[#allocation8 + $0x704] ss:$16 sps:$4 sm:$0xff]  }
 0x1f6   : > { %2340 = vmatpush1.bf16.msra.mxu0 %v3794_v19  ;;  %2504 = vmatpush1.bf16.msra.mxu1 %v3797_v20  ;;  %v3866_v19 = vld [vmem:[#allocation8 + $0x700] ss:$16 sps:$4 sm:$0xff]   ;;  %v3869_v20 = vld [vmem:[#allocation8 + $0x708] ss:$16 sps:$4 sm:$0xff]  }
 0x1f7   : > { %2341 = vmatprep.subr.bf16.mxu0 %v3802_v21  ;;  %2505 = vmatprep.subr.bf16.mxu1 %v3805_v51  ;;  %v3874_v21 = vld [vmem:[#allocation8 + $0x724] ss:$16 sps:$4 sm:$0xff]   ;;  %v3877_v51 = vld [vmem:[#allocation8 + $0x72c] ss:$16 sps:$4 sm:$0xff]  }
 0x1fa   : > { %2342 = vmatpush1.bf16.msra.mxu0 %v3800_v24  ;;  %2506 = vmatpush1.bf16.msra.mxu1 %v3803_v26  ;;  %v3880_v24 = vld [vmem:[#allocation8 + $0x744] ss:$16 sps:$4 sm:$0xff]   ;;  %v3883_v26 = vld [vmem:[#allocation8 + $0x74c] ss:$16 sps:$4 sm:$0xff]  }
 0x1fb   : > { %2343 = vmatprep.subr.bf16.mxu0 %v3808_v27  ;;  %2507 = vmatprep.subr.bf16.mxu1 %v3811_v4  ;;  %v3878_v27 = vld [vmem:[#allocation8 + $0x740] ss:$16 sps:$4 sm:$0xff]   ;;  %v3881_v4 = vld [vmem:[#allocation8 + $0x748] ss:$16 sps:$4 sm:$0xff]  }
 0x1fe   : > { %2344 = vmatpush1.bf16.msra.mxu0 %v3806_v31  ;;  %2508 = vmatpush1.bf16.msra.mxu1 %v3809_v32  ;;  %v3884_v31 = vld [vmem:[#allocation8 + $0x760] ss:$16 sps:$4 sm:$0xff]   ;;  %v3887_v32 = vld [vmem:[#allocation8 + $0x768] ss:$16 sps:$4 sm:$0xff]  }
 0x1ff   : > { %2345 = vmatprep.subr.bf16.mxu0 %v3814_v33  ;;  %2509 = vmatprep.subr.bf16.mxu1 %v3817_v34  ;;  %v3892_v33 = vld [vmem:[#allocation8 + $0x784] ss:$16 sps:$4 sm:$0xff]   ;;  %v3895_v34 = vld [vmem:[#allocation8 + $0x78c] ss:$16 sps:$4 sm:$0xff]  }
 0x202   : > { %2346 = vmatpush1.bf16.msra.mxu0 %v3812_v37  ;;  %2510 = vmatpush1.bf16.msra.mxu1 %v3815_v43  ;;  %v397_v37 = vsub.s32 6, %v4451_v38  ;;  %v3898_v43 = vld [vmem:[#allocation8 + $0x7a4] ss:$16 sps:$4 sm:$0xff]  }
 0x203   : > { %2356 = vmatprep.subr.bf16.mxu0 %v3820_v44  ;;  %2520 = vmatprep.subr.bf16.mxu1 %v3823_v45  ;;  %v3901_v44 = vld [vmem:[#allocation8 + $0x7ac] ss:$16 sps:$4 sm:$0xff]   ;;  %v3896_v45 = vld [vmem:[#allocation8 + $0x7a0] ss:$16 sps:$4 sm:$0xff]  }
 0x205   : > { %2348 = vmatmul.mubr.bf16.vlgmr.msra.gmra.mrb[8].mxu0 %v671_v46  ;;  %2512 = vmatmul.mubr.bf16.vlgmr.msra.gmra.mrb[8].mxu1 %v671_v46  ;;  %v398_v46 = vrot.slane %v4454_v40, %v397_v37  ;;  %v3914_v40 = vld [vmem:[#allocation10 + $0x40] sm:$0xff]  }
 0x206   : > { %2357 = vmatpush1.bf16.msra.mxu0 %v3818_v47  ;;  %2521 = vmatpush1.bf16.msra.mxu1 %v3821_v48  ;;  %v3904_v47 = vld [vmem:[#allocation8 + $0x7c4] ss:$16 sps:$4 sm:$0xff]   ;;  %v3907_v48 = vld [vmem:[#allocation8 + $0x7cc] ss:$16 sps:$4 sm:$0xff]  }
 0x207   : > { %2358 = vmatprep.subr.bf16.mxu0 %v3826_v49  ;;  %2522 = vmatprep.subr.bf16.mxu1 %v3829_v50  ;;  %v3902_v49 = vld [vmem:[#allocation8 + $0x7c0] ss:$16 sps:$4 sm:$0xff]   ;;  %v3905_v50 = vld [vmem:[#allocation8 + $0x7c8] ss:$16 sps:$4 sm:$0xff]  }
 0x208   : > { %2388 = vmatprep.mubr.bf16.mxu0 %v674_v28  ;;  %2552 = vmatprep.mubr.bf16.mxu1 %v674_v28  ;;  %v653_v28 = vadd.f32 %v4473_v25, %v398_v46  ;;  %v3918_v25 = vld [vmem:[#allocation10 + $0x48] sm:$0xff]  }
 0x20a   : > { %2359 = vmatpush1.bf16.msra.mxu0 %v3824_v52  ;;  %2523 = vmatpush1.bf16.msra.mxu1 %v3827_v53  ;;  %v3910_v52 = vld [vmem:[#allocation8 + $0x7e4] ss:$16 sps:$4 sm:$0xff]   ;;  %v3913_v53 = vld [vmem:[#allocation8 + $0x7ec] ss:$16 sps:$4 sm:$0xff]  }
 0x20b   : > { %2360 = vmatprep.subr.bf16.mxu0 %v3832_v54  ;;  %2524 = vmatprep.subr.bf16.mxu1 %v3835_v55  ;;  %v3908_v54 = vld [vmem:[#allocation8 + $0x7e0] ss:$16 sps:$4 sm:$0xff]   ;;  %v3911_v55 = vld [vmem:[#allocation8 + $0x7e8] ss:$16 sps:$4 sm:$0xff]  }
 0x20e   : > { %2361 = vmatpush1.bf16.msra.mxu0 %v3830_v56  ;;  %2525 = vmatpush1.bf16.msra.mxu1 %v3833_v57  ;;  %v665_v56 = vmax.f32 %v653_v28, 0.0  ;;  %v3915_v57 = vld [vmem:[#allocation10 + $0xc0] sm:$0xff]  }
 0x20f   : > { %2362 = vmatprep.subr.bf16.mxu0 %v3838_v58  ;;  %2526 = vmatprep.subr.bf16.mxu1 %v3841_v59  ;;  %v3916_v58 = vld [vmem:[#allocation10] sm:$0xff]  }
 0x210   : > { %v3917_v59 = vld [vmem:[#allocation10 + $0x80] sm:$0xff]  }
 0x212   : > { %2363 = vmatpush1.bf16.msra.mxu0 %v3836_v60  ;;  %2527 = vmatpush1.bf16.msra.mxu1 %v3839_v62  ;;  %v673_v60 = vpack.c.bf16 %v665_v56, %v665_v56  ;;  %v3919_v62 = vld [vmem:[#allocation10 + $0xc8] sm:$0xff]  }
 0x213   : > { %2364 = vmatprep.subr.bf16.mxu0 %v3844_v63  ;;  %2528 = vmatprep.subr.bf16.mxu1 %v3847_v0  ;;  %v3920_v63 = vld [vmem:[#allocation10 + $0x8] sm:$0xff]  }
 0x214   : > { %v3921_v0 = vld [vmem:[#allocation10 + $0x88] sm:$0xff]  }
 0x216   : > { %2365 = vmatpush1.bf16.msra.mxu0 %v3842_v1  ;;  %2529 = vmatpush1.bf16.msra.mxu1 %v3845_v2  ;;  %v3922_v1 = vld [vmem:[#allocation10 + $0x50] sm:$0xff]  }
 0x217   : > { %2366 = vmatprep.subr.bf16.mxu0 %v3850_v5  ;;  %2530 = vmatprep.subr.bf16.mxu1 %v3853_v6  ;;  %v3923_v2 = vld [vmem:[#allocation10 + $0xd0] sm:$0xff]  }
 0x218   : > { %v3924_v5 = vld [vmem:[#allocation10 + $0x10] sm:$0xff]  }
 0x219   : > { %v3925_v6 = vld [vmem:[#allocation10 + $0x90] sm:$0xff]  }
 0x21a   : > { %2367 = vmatpush1.bf16.msra.mxu0 %v3848_v7  ;;  %2531 = vmatpush1.bf16.msra.mxu1 %v3851_v8  ;;  %v3926_v7 = vld [vmem:[#allocation10 + $0x58] sm:$0xff]  }
 0x21b   : > { %2368 = vmatprep.subr.bf16.mxu0 %v3856_v9  ;;  %2532 = vmatprep.subr.bf16.mxu1 %v3859_v10  ;;  %v3927_v8 = vld [vmem:[#allocation10 + $0xd8] sm:$0xff]  }
 0x21c   : > { %v3928_v9 = vld [vmem:[#allocation10 + $0x18] sm:$0xff]  }
 0x21d   : > { %v3929_v10 = vld [vmem:[#allocation10 + $0x98] sm:$0xff]  }
 0x21e   : > { %2369 = vmatpush1.bf16.msra.mxu0 %v3854_v11  ;;  %2533 = vmatpush1.bf16.msra.mxu1 %v3857_v12  ;;  %v3930_v11 = vld [vmem:[#allocation10 + $0x60] sm:$0xff]  }
 0x21f   : > { %2370 = vmatprep.subr.bf16.mxu0 %v3862_v13  ;;  %2534 = vmatprep.subr.bf16.mxu1 %v3865_v14  ;;  %v3931_v12 = vld [vmem:[#allocation10 + $0xe0] sm:$0xff]  }
 0x220   : > { %v3932_v13 = vld [vmem:[#allocation10 + $0x20] sm:$0xff]  }
 0x221   : > { %v3933_v14 = vld [vmem:[#allocation10 + $0xa0] sm:$0xff]  }
 0x222   : > { %2371 = vmatpush1.bf16.msra.mxu0 %v3860_v15  ;;  %2535 = vmatpush1.bf16.msra.mxu1 %v3863_v16  ;;  %v3934_v15 = vld [vmem:[#allocation10 + $0x68] sm:$0xff]  }
 0x223   : > { %2372 = vmatprep.subr.bf16.mxu0 %v3868_v17  ;;  %2536 = vmatprep.subr.bf16.mxu1 %v3871_v18  ;;  %v3935_v16 = vld [vmem:[#allocation10 + $0xe8] sm:$0xff]  }
 0x224   : > { %v3936_v17 = vld [vmem:[#allocation10 + $0x28] sm:$0xff]  }
 0x225   : > { %v3937_v18 = vld [vmem:[#allocation10 + $0xa8] sm:$0xff]  }
 0x226   : > { %2373 = vmatpush1.bf16.msra.mxu0 %v3866_v19  ;;  %2537 = vmatpush1.bf16.msra.mxu1 %v3869_v20  ;;  %v3938_v19 = vld [vmem:[#allocation10 + $0x70] sm:$0xff]  }
 0x227   : > { %2374 = vmatprep.subr.bf16.mxu0 %v3874_v21  ;;  %2538 = vmatprep.subr.bf16.mxu1 %v3877_v51  ;;  %v3939_v20 = vld [vmem:[#allocation10 + $0xf0] sm:$0xff]  }
 0x228   : > { %v3940_v21 = vld [vmem:[#allocation10 + $0x30] sm:$0xff]  }
 0x229   : > { %v3941_v51 = vld [vmem:[#allocation10 + $0xb0] sm:$0xff]  }
 0x22a   : > { %2375 = vmatpush1.bf16.msra.mxu0 %v3872_v22  ;;  %2539 = vmatpush1.bf16.msra.mxu1 %v3875_v23  ;;  %v3942_v22 = vld [vmem:[#allocation10 + $0x78] sm:$0xff]  }
 0x22b   : > { %2376 = vmatprep.subr.bf16.mxu0 %v3880_v24  ;;  %2540 = vmatprep.subr.bf16.mxu1 %v3883_v26  ;;  %v3943_v23 = vld [vmem:[#allocation10 + $0xf8] sm:$0xff]  }
 0x22c   : > { %v3944_v24 = vld [vmem:[#allocation10 + $0x38] sm:$0xff]  }
 0x22d   : > { %v3945_v26 = vld [vmem:[#allocation10 + $0xb8] sm:$0xff]  }
 0x22e   : > { %2377 = vmatpush1.bf16.msra.mxu0 %v3878_v27  ;;  %2541 = vmatpush1.bf16.msra.mxu1 %v3881_v4  ;;  %v931_v27 = vld [vmem:[%s4562_s4] sm:$0xf] }
 0x22f   : > { %2378 = vmatprep.subr.bf16.mxu0 %v3886_v29  ;;  %2542 = vmatprep.subr.bf16.mxu1 %v3889_v30  ;;  %v936_v4 = vrot.slane %v931_v27, %v373_v39  ;;  %v944_v29 = vrot.slane %v931_v27, %v381_v61  ;;  %v940_v30 = vrot.slane %v931_v27, %v377_v41 }
 0x232   : > { %2379 = vmatpush1.bf16.msra.mxu0 %v3884_v31  ;;  %2543 = vmatpush1.bf16.msra.mxu1 %v3887_v32  ;;  %v948_v31 = vrot.slane %v931_v27, %v385_v42 }
 0x233   : > { %2380 = vmatprep.subr.bf16.mxu0 %v3892_v33  ;;  %2544 = vmatprep.subr.bf16.mxu1 %v3895_v34 }
 0x236   : > { %2381 = vmatpush1.bf16.msra.mxu0 %v3890_v35  ;;  %2545 = vmatpush1.bf16.msra.mxu1 %v3893_v36 }
 0x237   : > { %2382 = vmatprep.subr.bf16.mxu0 %v3898_v43  ;;  %2546 = vmatprep.subr.bf16.mxu1 %v3901_v44 }
 0x23a   : > { %2383 = vmatpush1.bf16.msra.mxu0 %v3896_v45  ;;  %2547 = vmatpush1.bf16.msra.mxu1 %v3899_v3 }
 0x23b   : > { %2384 = vmatprep.subr.bf16.mxu0 %v3904_v47  ;;  %2548 = vmatprep.subr.bf16.mxu1 %v3907_v48 }
 0x23e   : > { %2385 = vmatpush1.bf16.msra.mxu0 %v3902_v49  ;;  %2549 = vmatpush1.bf16.msra.mxu1 %v3905_v50 }
 0x23f   : > { %2386 = vmatprep.subr.bf16.mxu0 %v3910_v52  ;;  %2550 = vmatprep.subr.bf16.mxu1 %v3913_v53  ;;  %v3327_v53 = vld [vmem:[%s4564_s6] ss:$0 sm:$0xff] }
 0x242   : > { %2387 = vmatpush1.bf16.msra.mxu0 %v3908_v54  ;;  %2551 = vmatpush1.bf16.msra.mxu1 %v3911_v55 }
 0x243   : > { %3364 = vmatprep.subr.bf16.mxu0 %v3914_v40  ;;  %3386 = vmatprep.subr.bf16.mxu1 %v3915_v57 }
 0x245   : > { %2389 = vmatmul.mubr.bf16.vlgmr.msra.gmra.mrb[8].mxu0 %v673_v60  ;;  %2553 = vmatmul.mubr.bf16.vlgmr.msra.gmra.mrb[8].mxu1 %v673_v60 }
 0x246   : > { %3365 = vmatpush3.bf16.msra.mxu0 %v3916_v58  ;;  %3387 = vmatpush3.bf16.msra.mxu1 %v3917_v59 }
 0x247   : > { %3366 = vmatprep.subr.bf16.mxu0 %v3918_v25  ;;  %3388 = vmatprep.subr.bf16.mxu1 %v3919_v62 }
 0x24a   : > { %3367 = vmatpush3.bf16.msra.mxu0 %v3920_v63  ;;  %3389 = vmatpush3.bf16.msra.mxu1 %v3921_v0 }
 0x24b   : > { %3368 = vmatprep.subr.bf16.mxu0 %v3922_v1  ;;  %3390 = vmatprep.subr.bf16.mxu1 %v3923_v2 }
 0x24e   : > { %3369 = vmatpush3.bf16.msra.mxu0 %v3924_v5  ;;  %3391 = vmatpush3.bf16.msra.mxu1 %v3925_v6 }
 0x24f   : > { %3370 = vmatprep.subr.bf16.mxu0 %v3926_v7  ;;  %3392 = vmatprep.subr.bf16.mxu1 %v3927_v8 }
 0x252   : > { %3371 = vmatpush3.bf16.msra.mxu0 %v3928_v9  ;;  %3393 = vmatpush3.bf16.msra.mxu1 %v3929_v10 }
 0x253   : > { %3372 = vmatprep.subr.bf16.mxu0 %v3930_v11  ;;  %3394 = vmatprep.subr.bf16.mxu1 %v3931_v12 }
 0x256   : > { %3373 = vmatpush3.bf16.msra.mxu0 %v3932_v13  ;;  %3395 = vmatpush3.bf16.msra.mxu1 %v3933_v14 }
 0x257   : > { %3374 = vmatprep.subr.bf16.mxu0 %v3934_v15  ;;  %3396 = vmatprep.subr.bf16.mxu1 %v3935_v16 }
 0x25a   : > { %3375 = vmatpush3.bf16.msra.mxu0 %v3936_v17  ;;  %3397 = vmatpush3.bf16.msra.mxu1 %v3937_v18 }
 0x25b   : > { %3376 = vmatprep.subr.bf16.mxu0 %v3938_v19  ;;  %3398 = vmatprep.subr.bf16.mxu1 %v3939_v20 }
 0x25e   : > { %3377 = vmatpush3.bf16.msra.mxu0 %v3940_v21  ;;  %3399 = vmatpush3.bf16.msra.mxu1 %v3941_v51 }
 0x25f   : > { %3378 = vmatprep.subr.bf16.mxu0 %v3942_v22  ;;  %3400 = vmatprep.subr.bf16.mxu1 %v3943_v23 }
 0x262   : > { %3379 = vmatpush3.bf16.msra.mxu0 %v3944_v24  ;;  %3401 = vmatpush3.bf16.msra.mxu1 %v3945_v26 }
 0x318   : > { %v2390_v32 = vpop.f32.mrb[8].mxu0  ;;  %v2554_v33 = vpop.f32.mrb[8].mxu1 }
 0x319   : > { %v3408_v34 = vadd.f32 %v2390_v32, %v936_v4  ;;  %v3410_v35 = vadd.f32 %v2554_v33, %v944_v29  ;;  %v2392_v36 = vpop.f32.mrb[9].mxu0  ;;  %v2556_v37 = vpop.f32.mrb[9].mxu1 }
 0x31a   : > { %v3409_v43 = vadd.f32 %v2392_v36, %v940_v30  ;;  %v3411_v44 = vadd.f32 %v2556_v37, %v948_v31  ;;  %v2394_v45 = vpop.f32.mrb[10].mxu0  ;;  %v2558_v3 = vpop.f32.mrb[10].mxu1 }
 0x31b   : > { %v2561_v39 = vmax.f32 %v3408_v34, 0.0  ;;  %v2563_v46 = vmax.f32 %v3410_v35, 0.0  ;;  %v2395_v47 = vpop.f32.mrb[11].mxu0  ;;  %v2559_v61 = vpop.f32.mrb[11].mxu1 }
 0x31c   : > { %v2562_v48 = vmax.f32 %v3409_v43, 0.0  ;;  %v2564_v49 = vmax.f32 %v3411_v44, 0.0 }
 0x31d   : > { %v2565_v38 = vpack.c.bf16 %v2561_v39, %v2561_v39  ;;  %v2567_v42 = vpack.c.bf16 %v2563_v46, %v2563_v46 }
 0x31e   : > { %v2566_v41 = vpack.c.bf16 %v2562_v48, %v2562_v48  ;;  %v2568_v50 = vpack.c.bf16 %v2564_v49, %v2564_v49 }
 0x320   : > { %2864 = vmatprep.mubr.bf16.mxu0 %v2566_v41  ;;  %2904 = vmatprep.mubr.bf16.mxu1 %v2568_v50 }
 0x321   : > { %2865 = vmatmul.mubr.bf16.vlgmr.msra.gmra.mrb[12].mxu0 %v2565_v38  ;;  %2905 = vmatmul.mubr.bf16.vlgmr.msra.gmra.mrb[12].mxu1 %v2567_v42 }
 0x3f4   : > { %v3380_v28 = vpop.f32.mrb[12].mxu0  ;;  %v3402_v52 = vpop.f32.mrb[12].mxu1 }
 0x3f5   : > { %v3381_v54 = vpop.f32.mrb[13].mxu0  ;;  %v3403_v55 = vpop.f32.mrb[13].mxu1 }
 0x3f6   : > { %v3382_v56 = vadd.f32 %v3381_v54, %v3380_v28  ;;  %v3404_v40 = vadd.f32 %v3403_v55, %v3402_v52  ;;  %v3383_v57 = vpop.f32.mrb[14].mxu0  ;;  %v3405_v58 = vpop.f32.mrb[14].mxu1 }
 0x3f7   : > { %v3384_v59 = vpop.f32.mrb[15].mxu0  ;;  %v3406_v60 = vpop.f32.mrb[15].mxu1 }
 0x3f8   : > { %v2867_v25 = vadd.f32 %v3382_v56, %v3327_v53 }
 0x3fa   : > { %v2907_v62 = vadd.f32 %v3404_v40, %v2867_v25 }
 0x3fc   : > { %2912 = vst [vmem:[%s349_s22] sm:$0xff] %v2907_v62 }
 0x3fd   : > { %4101 = shalt.err (!%p4098_p12)
}
 0x3fe   : > { %s4102_s28 = scalar_lea.hbm %s4514_s17, 128  ;;  %s4106_s21 = scalar_lea.hbm %s4565_s7, 256 }
 0x3ff   : > { %p4103_p13 = scmp.ne.s32.totalorder %s4514_s17, %s4102_s28  ;;  %p4107_p9 = scmp.lt.u32.totalorder %s4514_s17, %s4565_s7 }
 0x400   : > { %p4108_p4 = scmp.lt.u32.totalorder %s4106_s21, %s4102_s28  ;;  %p4110_p6 = scmp.lt.u32.totalorder %s4102_s28, %s4514_s17 }
 0x401   : > { %p4104_p1 = pnand %p4103_p13, %p4583_p0 }
 0x402   : > { %p4109_p8 = por %p4108_p4, %p4107_p9 }
 0x403   : > { %p4105_p7 = pneg %p4104_p1 }
 0x404   : > { %p4111_p2 = por %p4110_p6, %p4109_p8 }
 0x406   : > { %p4112_p5 = pnand %p4111_p2, %p4105_p7 }
 0x408   : > { %4115 = shalt.err (!%p4112_p5)
}
 0x409   : > { %3454 = dma.vmem_to_hbm [thread:$0]  (%p4583_p0), %s4516_s12, 128, %s4514_s17, %s2914_s11  }
 0x40a PF: > { %s2939_s20 = sand.u32 1, %s4150_s24   ;;  %p4584_p10 = scmp.ne.s32.totalorder %s4576_s15, 0 }
 0x40b   : > { %p4585_p11 = scmp.ge.s32.totalorder %s4162_s27, 2  ;;  %s2940_s16 = scalar_lea.sflag [#allocation4], %s2939_s20 }
 0x40d   : > { %p3474_p3 = pnand %p4585_p11, %p4584_p10 }
 0x40f   : > { %4145 = dma.done.wait (!%p3474_p3), %s2940_s16, 128  }
 0x410   : > { %4147 = vsyncadd (!%p3474_p3), %s2940_s16, 4294967168  ;;  %p22_p12 = scmp.ge.s32.totalorder %s4353_s29, 4   ;;  %s4586_s24 = smov %s4154_s25 }
 0x411   : > { %s4587_s25 = smov %s4158_s26  ;;  %s4588_s26 = smov %s4364_s9 }
 0x412   : > { %s4589_s27 = smov %s4353_s29  ;;  %24 = sbr.rel (!%p22_p12) target bundleno = 7 (0x7), region = 109 }
 0x419   :  { %2945 = vsyncpa [#allocation3], 1 }
 0x41a   :  { %2947 = vsyncpa [#allocation3 + $0x1], 1 }
 0x41b   :  { %2948 = vsyncpa [#allocation6], 1 }
 0x41c   :  { %2949 = vsyncpa [#allocation9], 1 }
 0x41d   :  { %2950 = vsyncpa [#allocation4], 1 }
 0x41e   :  { %2952 = vsyncpa [#allocation4 + $0x1], 1 }

</bundles_post_ra>
